<compile_context>
chip_gen: v5e
topology: v5e:2x2
jax: 0.10.0
libtpu: 0.0.40
codegen_flags: <defaults>
</compile_context>

<pallas_src>
import jax
import jax.numpy as jnp
from jax.experimental import pallas as pl
from jax.experimental.pallas import tpu as pltpu


def _round_up(x, m):
    return ((x + m - 1) // m) * m


def _value_kernel(x_ref, w1_ref, b1_ref, w2_ref, b2_ref, wv_ref, bv_ref, o_ref):
    """One batch tile of the fused encoder-MLP + value head.

    x_ref : [TB, F]    state tile (any dtype; cast in-kernel)
    w1    : [F, H1] bf16, b1: [1, H1] f32
    w2    : [H1, D] bf16, b2: [1, D] f32
    wv    : [D, 1]  f32,  bv: [1, 1] f32
    o_ref : [1, 1, TB] f32  lane-dense row of values for this batch tile
    """
    x = x_ref[...].astype(jnp.bfloat16)  # in-kernel cast (free VPU work)
    h1 = jnp.dot(x, w1_ref[...], preferred_element_type=jnp.float32) + b1_ref[...]
    h1 = jnp.maximum(h1, 0.0)
    h2 = jnp.dot(h1.astype(jnp.bfloat16), w2_ref[...],
                 preferred_element_type=jnp.float32) + b2_ref[...]
    h2 = jnp.maximum(h2, 0.0)
    # Value head [TB, D] @ [D, 1]: transpose (XLU) + multiply (VPU) + sublane
    # reduce instead of a wasteful N=1 MXU matmul; result is lane-dense.
    v = jnp.sum(h2.T * wv_ref[...], axis=0, keepdims=True) + bv_ref[...]  # [1, TB]
    o_ref[...] = v[None].astype(o_ref.dtype)


def value_model_forward(state, params):
    """Equivalent of ValueModel.forward: returns value of shape [B]."""
    B = state.shape[0]
    # Flatten NCHW -> [B, F]; keep native dtype, cast happens inside the kernel.
    x = state.reshape(B, -1)
    F_in = x.shape[1]

    w1, b1, w2, b2, wv, bv = params
    H1 = w1.shape[1]
    D = w2.shape[1]

    # Batch tile: multiple of 128 (lane width), capped at 512 (2 MiB f32 x-tile).
    TB = min(512, _round_up(max(B, 1), 128))
    B_pad = _round_up(B, TB)
    G = B_pad // TB
    if B_pad != B:
        x = jnp.pad(x, ((0, B_pad - B), (0, 0)))

    flops = 2 * B_pad * (F_in * H1 + H1 * D + D)
    bytes_accessed = (
        x.size * x.dtype.itemsize
        + sum(int(p.size) * p.dtype.itemsize for p in params)
        + B_pad * 4
    )

    out = pl.pallas_call(
        _value_kernel,
        out_shape=jax.ShapeDtypeStruct((G, 1, TB), jnp.float32),
        grid=(G,),
        in_specs=[
            pl.BlockSpec((TB, F_in), lambda i: (i, 0)),   # x: tiled over batch
            pl.BlockSpec((F_in, H1), lambda i: (0, 0)),   # w1: loaded once, VMEM-resident
            pl.BlockSpec((1, H1), lambda i: (0, 0)),      # b1
            pl.BlockSpec((H1, D), lambda i: (0, 0)),      # w2
            pl.BlockSpec((1, D), lambda i: (0, 0)),       # b2
            pl.BlockSpec((D, 1), lambda i: (0, 0)),       # wv (column)
            pl.BlockSpec((1, 1), lambda i: (0, 0)),       # bv
        ],
        out_specs=pl.BlockSpec((1, 1, TB), lambda i: (i, 0, 0)),
        compiler_params=pltpu.CompilerParams(
            dimension_semantics=("parallel",)),           # v7x: shard batch tiles across TCs
        cost_estimate=pl.CostEstimate(
            flops=flops, transcendentals=0, bytes_accessed=bytes_accessed),
    )(x, w1, b1, w2, b2, wv, bv)

    # .view(-1) in the PyTorch module (drop batch padding).
    return out.reshape(-1)[:B]


def init_params(key, flat_features, hidden, dense_size):
    """PyTorch-Linear-style init: U(-1/sqrt(fan_in), 1/sqrt(fan_in)).

    Hidden-layer weights are stored in bf16 (MXU-native, half the HBM bytes);
    biases and the tiny value head stay f32.
    """
    def linear(k, fan_in, fan_out, w_dtype):
        k_w, k_b = jax.random.split(k)
        bound = float(1.0 / (fan_in ** 0.5))
        w = jax.random.uniform(k_w, (fan_in, fan_out), jnp.float32, -bound, bound)
        b = jax.random.uniform(k_b, (1, fan_out), jnp.float32, -bound, bound)
        return w.astype(w_dtype), b

    k1, k2, k3 = jax.random.split(key, 3)
    w1, b1 = linear(k1, flat_features, hidden, jnp.bfloat16)   # encoder layer 1
    w2, b2 = linear(k2, hidden, dense_size, jnp.bfloat16)      # encoder layer 2
    wv, bv = linear(k3, dense_size, 1, jnp.float32)            # V head: Linear(dense_size, 1)
    return (w1, b1, w2, b2, wv, bv)


if __name__ == "__main__":
    # Small example shapes consistent with the module (image-like state).
    # In a real rollout, stack many env states so B >= 128 per call; the kernel
    # tiles/pads the batch either way.
    B, C, H, W = 2, 4, 16, 16
    flat_features = C * H * W        # 1024
    hidden = 128                     # encoder hidden width (lane-width aligned)
    dense_size = 128                 # self.model.dense_size (lane-width aligned)

    key = jax.random.PRNGKey(0)
    k_state, k_params = jax.random.split(key)

    state = jax.random.normal(k_state, (B, C, H, W), jnp.float32)  # NCHW
    params = init_params(k_params, flat_features, hidden, dense_size)

    value = value_model_forward(state, params)
    jax.block_until_ready(value)
    assert value.shape == (B,), value.shape

    # Pure-JAX reference with the same precision recipe (bf16 inputs, f32 acc).
    w1, b1, w2, b2, wv, bv = params
    x = state.reshape(B, -1)
    h1 = jnp.maximum(
        jnp.dot(x.astype(jnp.bfloat16), w1, preferred_element_type=jnp.float32) + b1, 0.0)
    h2 = jnp.maximum(
        jnp.dot(h1.astype(jnp.bfloat16), w2, preferred_element_type=jnp.float32) + b2, 0.0)
    ref = (h2 @ wv + bv).reshape(-1)
    assert jnp.allclose(value, ref, atol=2e-3, rtol=2e-3), (value, ref)

    # TODO(synk): loss/backprop/optimiser/scheduler are training-only host logic,
    # not part of the forward kernel.
    print("KERNEL_OK")
</pallas_src>

<mosaic_0001>
module attributes {stable_mosaic.version = 11 : i64} {
  func.func @_value_kernel(%arg0: i32, %arg1: memref<128x1024xf32, #tpu.memory_space<vmem>>, %arg2: memref<1024x128xbf16, #tpu.memory_space<vmem>>, %arg3: memref<1x128xf32, #tpu.memory_space<vmem>>, %arg4: memref<128x128xbf16, #tpu.memory_space<vmem>>, %arg5: memref<1x128xf32, #tpu.memory_space<vmem>>, %arg6: memref<128x1xf32, #tpu.memory_space<vmem>>, %arg7: memref<1x1xf32, #tpu.memory_space<vmem>>, %arg8: memref<1x1x128xf32, #tpu.memory_space<vmem>>) attributes {dimension_semantics = [#tpu.dimension_semantics<parallel>], iteration_bounds = array<i64: 1>, scalar_prefetch = 0 : i64, scratch_operands = 0 : i64, tpu.core_type = #tpu.core_type<tc>, window_params = [{transform_indices = @transform_0, window_bounds = array<i64: 128, 1024>}, {pipeline_mode = #tpu.pipeline_mode<synchronous>, transform_indices = @transform_1, window_bounds = array<i64: 1024, 128>}, {pipeline_mode = #tpu.pipeline_mode<synchronous>, transform_indices = @transform_2, window_bounds = array<i64: 1, 128>}, {pipeline_mode = #tpu.pipeline_mode<synchronous>, transform_indices = @transform_3, window_bounds = array<i64: 128, 128>}, {pipeline_mode = #tpu.pipeline_mode<synchronous>, transform_indices = @transform_4, window_bounds = array<i64: 1, 128>}, {pipeline_mode = #tpu.pipeline_mode<synchronous>, transform_indices = @transform_5, window_bounds = array<i64: 128, 1>}, {pipeline_mode = #tpu.pipeline_mode<synchronous>, transform_indices = @transform_6, window_bounds = array<i64: 1, 1>}, {transform_indices = @transform_7, window_bounds = array<i64: 1, 1, 128>}]} {
    %c0 = arith.constant 0 : index
    %c0_0 = arith.constant 0 : index
    %0 = vector.load %arg1[%c0, %c0_0] : memref<128x1024xf32, #tpu.memory_space<vmem>>, vector<128x1024xf32>
    %1 = arith.truncf %0 : vector<128x1024xf32> to vector<128x1024xbf16>
    %c0_1 = arith.constant 0 : index
    %c0_2 = arith.constant 0 : index
    %2 = vector.load %arg2[%c0_1, %c0_2] : memref<1024x128xbf16, #tpu.memory_space<vmem>>, vector<1024x128xbf16>
    %cst = arith.constant dense<0.000000e+00> : vector<128x128xf32>
    %3 = tpu.matmul %1, %2, %cst {dimension_numbers = #tpu.dot_dimension_numbers<[1], [0], [0], [1], [0, 0, 1, 1], [], []>} : vector<128x1024xbf16>, vector<1024x128xbf16>, vector<128x128xf32> -> vector<128x128xf32>
    %c0_3 = arith.constant 0 : index
    %c0_4 = arith.constant 0 : index
    %4 = vector.load %arg3[%c0_3, %c0_4] : memref<1x128xf32, #tpu.memory_space<vmem>>, vector<1x128xf32>
    %5 = vector.broadcast %4 : vector<1x128xf32> to vector<128x128xf32>
    %6 = arith.addf %3, %5 : vector<128x128xf32>
    %cst_5 = arith.constant 0.000000e+00 : f32
    %7 = vector.broadcast %cst_5 : f32 to vector<128x128xf32>
    %8 = arith.maximumf %6, %7 : vector<128x128xf32>
    %9 = arith.truncf %8 : vector<128x128xf32> to vector<128x128xbf16>
    %c0_6 = arith.constant 0 : index
    %c0_7 = arith.constant 0 : index
    %10 = vector.load %arg4[%c0_6, %c0_7] : memref<128x128xbf16, #tpu.memory_space<vmem>>, vector<128x128xbf16>
    %cst_8 = arith.constant dense<0.000000e+00> : vector<128x128xf32>
    %11 = tpu.matmul %9, %10, %cst_8 {dimension_numbers = #tpu.dot_dimension_numbers<[1], [0], [0], [1], [0, 0, 1, 1], [], []>} : vector<128x128xbf16>, vector<128x128xbf16>, vector<128x128xf32> -> vector<128x128xf32>
    %c0_9 = arith.constant 0 : index
    %c0_10 = arith.constant 0 : index
    %12 = vector.load %arg5[%c0_9, %c0_10] : memref<1x128xf32, #tpu.memory_space<vmem>>, vector<1x128xf32>
    %13 = vector.broadcast %12 : vector<1x128xf32> to vector<128x128xf32>
    %14 = arith.addf %11, %13 : vector<128x128xf32>
    %cst_11 = arith.constant 0.000000e+00 : f32
    %15 = vector.broadcast %cst_11 : f32 to vector<128x128xf32>
    %16 = arith.maximumf %14, %15 : vector<128x128xf32>
    %17 = tpu.transpose %16, [1, 0] : vector<128x128xf32> -> vector<128x128xf32>
    %c0_12 = arith.constant 0 : index
    %c0_13 = arith.constant 0 : index
    %18 = vector.load %arg6[%c0_12, %c0_13] : memref<128x1xf32, #tpu.memory_space<vmem>>, vector<128x1xf32>
    %19 = vector.broadcast %18 : vector<128x1xf32> to vector<128x128xf32>
    %20 = arith.mulf %17, %19 : vector<128x128xf32>
    %cst_14 = arith.constant dense<0.000000e+00> : vector<128xf32>
    %21 = vector.multi_reduction <add>, %20, %cst_14 [0] : vector<128x128xf32> to vector<128xf32>
    %22 = vector.shape_cast %21 : vector<128xf32> to vector<1x128xf32>
    %c0_15 = arith.constant 0 : index
    %c0_16 = arith.constant 0 : index
    %23 = vector.load %arg7[%c0_15, %c0_16] : memref<1x1xf32, #tpu.memory_space<vmem>>, vector<1x1xf32>
    %24 = vector.broadcast %23 : vector<1x1xf32> to vector<1x128xf32>
    %25 = arith.addf %22, %24 : vector<1x128xf32>
    %26 = vector.shape_cast %25 : vector<1x128xf32> to vector<1x1x128xf32>
    %c0_17 = arith.constant 0 : index
    %c0_18 = arith.constant 0 : index
    %c0_19 = arith.constant 0 : index
    %27 = vector.load %arg8[%c0_17, %c0_18, %c0_19] : memref<1x1x128xf32, #tpu.memory_space<vmem>>, vector<1x1x128xf32>
    tpu.vector_store %arg8[%c0_17, %c0_18, %c0_19], %26 {strides = array<i32>} : memref<1x1x128xf32, #tpu.memory_space<vmem>>, vector<1x1x128xf32>,
    return
  }
  func.func @transform_0(%arg0: i32) -> (i32, i32) {
    %c0_i32 = arith.constant 0 : i32
    %c0_i32_0 = arith.constant 0 : i32
    return %arg0, %c0_i32 : i32, i32
  }
  func.func @transform_1(%arg0: i32) -> (i32, i32) {
    %c0_i32 = arith.constant 0 : i32
    %c0_i32_0 = arith.constant 0 : i32
    %c0_i32_1 = arith.constant 0 : i32
    return %c0_i32, %c0_i32_0 : i32, i32
  }
  func.func @transform_2(%arg0: i32) -> (i32, i32) {
    %c0_i32 = arith.constant 0 : i32
    %c0_i32_0 = arith.constant 0 : i32
    %c0_i32_1 = arith.constant 0 : i32
    return %c0_i32, %c0_i32_0 : i32, i32
  }
  func.func @transform_3(%arg0: i32) -> (i32, i32) {
    %c0_i32 = arith.constant 0 : i32
    %c0_i32_0 = arith.constant 0 : i32
    %c0_i32_1 = arith.constant 0 : i32
    return %c0_i32, %c0_i32_0 : i32, i32
  }
  func.func @transform_4(%arg0: i32) -> (i32, i32) {
    %c0_i32 = arith.constant 0 : i32
    %c0_i32_0 = arith.constant 0 : i32
    %c0_i32_1 = arith.constant 0 : i32
    return %c0_i32, %c0_i32_0 : i32, i32
  }
  func.func @transform_5(%arg0: i32) -> (i32, i32) {
    %c0_i32 = arith.constant 0 : i32
    %c0_i32_0 = arith.constant 0 : i32
    %c0_i32_1 = arith.constant 0 : i32
    return %c0_i32, %c0_i32_0 : i32, i32
  }
  func.func @transform_6(%arg0: i32) -> (i32, i32) {
    %c0_i32 = arith.constant 0 : i32
    %c0_i32_0 = arith.constant 0 : i32
    %c0_i32_1 = arith.constant 0 : i32
    return %c0_i32, %c0_i32_0 : i32, i32
  }
  func.func @transform_7(%arg0: i32) -> (i32, i32, i32) {
    %c0_i32 = arith.constant 0 : i32
    %c0_i32_0 = arith.constant 0 : i32
    %c0_i32_1 = arith.constant 0 : i32
    return %arg0, %c0_i32, %c0_i32_0 : i32, i32, i32
  }
}

</mosaic_0001>

<bundles_post_ra>
// kernel: tpu_custom_call.1
= control target key start
LH: loop header
LB: loop body
LE: loop exit
PB: predicated region body
PF: predicated region fallthrough
CT: control target
= control target key end

     0   :  { %s2244_s0 = inlined_call_operand.hbm [shape: f32[128,1024], index: 0, kind: input, shape index: {}]   ;;  %s2245_s1 = inlined_call_operand.hbm [shape: bf16[1024,128], index: 1, kind: input, shape index: {}]   ;;  %s2246_s2 = inlined_call_operand.vmem [shape: f32[1,128], index: 2, kind: input, shape index: {}]   ;;  %s2247_s3 = inlined_call_operand.vmem [shape: bf16[128,128], index: 3, kind: input, shape index: {}]   ;;  %s2248_s4 = inlined_call_operand.vmem [shape: f32[1,128], index: 4, kind: input, shape index: {}]   ;;  %s2249_s5 = inlined_call_operand.vmem [shape: f32[128,1], index: 5, kind: input, shape index: {}]   ;;  %s2250_s6 = inlined_call_operand.<no memory space> [shape: f32[1,1], index: 6, kind: input, shape index: {}]   ;;  %s2251_s7 = inlined_call_operand.hbm [shape: f32[1,1,128], index: 7, kind: output, shape index: {}]  }
   0x1   :  { %v12_v0 = vstv %s2250_s6 }
   0x2   :  { %13 = vst [vmem:[#allocation2] sm:$0x1] %v12_v0 }
   0x3   :  { %14 = vsyncpa [#allocation4], 0 }
   0x4   :  { %15 = vsyncpa [#allocation7], 0 }
   0x5   :  { %16 = vsyncpa [#allocation5], 0  ;;  %s21_s28 = sshll.u32 %s2244_s0, 4  ;;  %s1984_s29 = smov [#allocation3]   ;;  %s22_s28 = int_to_ptr.hbm [resolvable:$true] %s21_s28 }
   0x6   :  { %s23_s30 = sshll.u32 %s1984_s29, 4  ;;  %s34_s10 = sshll.u32 %s2245_s1, 4  ;;  %s24_s30 = int_to_ptr.vmem [resolvable:$true] %s23_s30  ;;  %s35_s10 = int_to_ptr.hbm [resolvable:$true] %s34_s10 }
   0x7   :  { %s1985_s11 = smov 1024   ;;  %s1986_s12 = smov 64  }
   0x8   :  { %29 = dma.hbm_to_vmem [thread:$0]  %s22_s28, 16384, %s24_s30, [#allocation4], %s1985_s11, %s1985_s11, %s1986_s12  }
   0x9   :  { %s1987_s6 = smov [#allocation6]   ;;  %s1988_s14 = smov 4  }
   0xa   :  { %s36_s13 = sshll.u32 %s1987_s6, 4  ;;  %s37_s13 = int_to_ptr.vmem [resolvable:$true] %s36_s13 }
   0xb   :  { %42 = dma.hbm_to_vmem [thread:$0]  %s35_s10, 8192, %s37_s13, [#allocation7], %s1986_s12, %s1986_s12, %s1988_s14  }
   0xc   :  { %1978 = dma.done.wait [#allocation4], 16384  }
   0xd   :  { %1979 = vsyncadd [#allocation4], 4294950912 }
   0xe   :  { %1980 = dma.done.wait [#allocation7], 8192  }
   0xf   :  { %1981 = vsyncadd [#allocation7], 4294959104  ;;  %v1805_v1 = vld [vmem:[#allocation6 + $0x38] sm:$0xff]  ;;  %v1804_v2 = vld [vmem:[#allocation6 + $0x30] sm:$0xff]  ;;  %s1499_s6 = sshll.u32 %s2251_s7, 4  ;;  %s1500_s6 = int_to_ptr.hbm [resolvable:$true] %s1499_s6 }
  0x10   :  { %1870 = vmatpush.bf16.msra.mxu1 %v1805_v1  ;;  %1871 = vmatpush.bf16.msra.mxu2 %v1805_v1  ;;  %v1803_v3 = vld [vmem:[#allocation6 + $0x28] sm:$0xff]  ;;  %v1802_v4 = vld [vmem:[#allocation6 + $0x20] sm:$0xff]  ;;  %v1801_v5 = vld [vmem:[#allocation6 + $0x18] sm:$0xff] }
  0x11   :  { %1872 = vmatpush.bf16.msra.mxu3 %v1805_v1  ;;  %769 = vmatpush.bf16.msra.mxu0 %v1805_v1  ;;  %v1800_v6 = vld [vmem:[#allocation6 + $0x10] sm:$0xff]  ;;  %v1799_v7 = vld [vmem:[#allocation6 + $0x8] sm:$0xff]  ;;  %v1798_v8 = vld [vmem:[#allocation6] sm:$0xff] }
  0x12   :  { %v93_v9 = vld [vmem:[#allocation3 + $0x100] sm:$0xff]  ;;  %v1821_v15 = vld [vmem:[#allocation6 + $0xb8] sm:$0xff]  ;;  %v1820_v23 = vld [vmem:[#allocation6 + $0xb0] sm:$0xff] }
  0x13   :  { %v101_v10 = vld [vmem:[#allocation3 + $0x140] sm:$0xff]  ;;  %v1813_v16 = vld [vmem:[#allocation6 + $0x78] sm:$0xff]  ;;  %v1812_v25 = vld [vmem:[#allocation6 + $0x70] sm:$0xff] }
  0x14   :  { %1873 = vmatpush.bf16.msra.mxu1 %v1804_v2  ;;  %1874 = vmatpush.bf16.msra.mxu2 %v1804_v2  ;;  %v125_v11 = vld [vmem:[#allocation3 + $0x200] sm:$0xff]  ;;  %v1829_v17 = vld [vmem:[#allocation6 + $0xf8] sm:$0xff]  ;;  %v205_v18 = vpack.c.bf16 %v101_v10, %v93_v9  ;;  %v1828_v26 = vld [vmem:[#allocation6 + $0xf0] sm:$0xff] }
  0x15   :  { %1875 = vmatpush.bf16.msra.mxu3 %v1804_v2  ;;  %770 = vmatpush.bf16.msra.mxu0 %v1804_v2  ;;  %v133_v12 = vld [vmem:[#allocation3 + $0x240] sm:$0xff]  ;;  %v1837_v24 = vld [vmem:[#allocation6 + $0x138] sm:$0xff]  ;;  %v1819_v28 = vld [vmem:[#allocation6 + $0xa8] sm:$0xff] }
  0x16   :  { %v157_v13 = vld [vmem:[#allocation3 + $0x300] sm:$0xff]  ;;  %v221_v19 = vpack.c.bf16 %v133_v12, %v125_v11  ;;  %v1836_v29 = vld [vmem:[#allocation6 + $0x130] sm:$0xff]  ;;  %v1811_v30 = vld [vmem:[#allocation6 + $0x68] sm:$0xff] }
  0x17   :  { %v165_v14 = vld [vmem:[#allocation3 + $0x340] sm:$0xff]  ;;  %v1827_v31 = vld [vmem:[#allocation6 + $0xe8] sm:$0xff]  ;;  %v1817_v42 = vld [vmem:[#allocation6 + $0x98] sm:$0xff] }
  0x18   :  { %1876 = vmatpush.bf16.msra.mxu1 %v1803_v3  ;;  %1877 = vmatpush.bf16.msra.mxu2 %v1803_v3  ;;  %v237_v20 = vpack.c.bf16 %v165_v14, %v157_v13  ;;  %v61_v21 = vld [vmem:[#allocation3] sm:$0xff]  ;;  %v1835_v33 = vld [vmem:[#allocation6 + $0x128] sm:$0xff]  ;;  %v1809_v44 = vld [vmem:[#allocation6 + $0x58] sm:$0xff] }
  0x19   :  { %1878 = vmatpush.bf16.msra.mxu3 %v1803_v3  ;;  %771 = vmatpush.bf16.msra.mxu0 %v1803_v3  ;;  %v69_v22 = vld [vmem:[#allocation3 + $0x40] sm:$0xff]  ;;  %v1825_v45 = vld [vmem:[#allocation6 + $0xd8] sm:$0xff]  ;;  %v1816_v51 = vld [vmem:[#allocation6 + $0x90] sm:$0xff] }
  0x1a   :  { %v189_v27 = vpack.c.bf16 %v69_v22, %v61_v21  ;;  %v1818_v32 = vld [vmem:[#allocation6 + $0xa0] sm:$0xff]  ;;  %v1833_v52 = vld [vmem:[#allocation6 + $0x118] sm:$0xff]  ;;  %v1808_v53 = vld [vmem:[#allocation6 + $0x50] sm:$0xff] }
  0x1b   :  { %v1810_v34 = vld [vmem:[#allocation6 + $0x60] sm:$0xff]  ;;  %v1824_v54 = vld [vmem:[#allocation6 + $0xd0] sm:$0xff]  ;;  %v1815_v56 = vld [vmem:[#allocation6 + $0x88] sm:$0xff] }
  0x1c   :  { %1879 = vmatpush.bf16.msra.mxu1 %v1802_v4  ;;  %1880 = vmatpush.bf16.msra.mxu2 %v1802_v4  ;;  %v1826_v35 = vld [vmem:[#allocation6 + $0xe0] sm:$0xff]  ;;  %v1832_v57 = vld [vmem:[#allocation6 + $0x110] sm:$0xff]  ;;  %v1807_v58 = vld [vmem:[#allocation6 + $0x48] sm:$0xff] }
  0x1d   :  { %1881 = vmatpush.bf16.msra.mxu3 %v1802_v4  ;;  %772 = vmatpush.bf16.msra.mxu0 %v1802_v4  ;;  %v109_v36 = vld [vmem:[#allocation3 + $0x180] sm:$0xff]  ;;  %v1823_v59 = vld [vmem:[#allocation6 + $0xc8] sm:$0xff]  ;;  %v1853_v2 = vld [vmem:[#allocation6 + $0x1b8] sm:$0xff] }
  0x1e   :  { %v117_v37 = vld [vmem:[#allocation3 + $0x1c0] sm:$0xff]  ;;  %v1831_v61 = vld [vmem:[#allocation6 + $0x108] sm:$0xff]  ;;  %v1861_v3 = vld [vmem:[#allocation6 + $0x1f8] sm:$0xff] }
  0x1f   :  { %v141_v38 = vld [vmem:[#allocation3 + $0x280] sm:$0xff]  ;;  %v213_v46 = vpack.c.bf16 %v117_v37, %v109_v36  ;;  %v62_v0 = vld [vmem:[#allocation3 + $0x8] sm:$0xff]  ;;  %v63_v4 = vld [vmem:[#allocation3 + $0x10] sm:$0xff] }
  0x20   :  { %1882 = vmatpush.bf16.msra.mxu1 %v1801_v5  ;;  %1883 = vmatpush.bf16.msra.mxu2 %v1801_v5  ;;  %v149_v39 = vld [vmem:[#allocation3 + $0x2c0] sm:$0xff]  ;;  %v70_v1 = vld [vmem:[#allocation3 + $0x48] sm:$0xff] }
  0x21   :  { %1884 = vmatpush.bf16.msra.mxu3 %v1801_v5  ;;  %773 = vmatpush.bf16.msra.mxu0 %v1801_v5  ;;  %v173_v40 = vld [vmem:[#allocation3 + $0x380] sm:$0xff]  ;;  %v229_v47 = vpack.c.bf16 %v149_v39, %v141_v38  ;;  %v71_v5 = vld [vmem:[#allocation3 + $0x50] sm:$0xff]  ;;  %v190_v10 = vpack.c.bf16 %v70_v1, %v62_v0  ;;  %v1843_v21 = vld [vmem:[#allocation6 + $0x168] sm:$0xff] }
  0x22   :  { %v181_v41 = vld [vmem:[#allocation3 + $0x3c0] sm:$0xff]  ;;  %v191_v11 = vpack.c.bf16 %v71_v5, %v63_v4  ;;  %v78_v22 = vld [vmem:[#allocation3 + $0x88] sm:$0xff]  ;;  %v95_v39 = vld [vmem:[#allocation3 + $0x110] sm:$0xff] }
  0x23   :  { %v1834_v43 = vld [vmem:[#allocation6 + $0x120] sm:$0xff]  ;;  %v245_v48 = vpack.c.bf16 %v181_v41, %v173_v40  ;;  %v94_v37 = vld [vmem:[#allocation3 + $0x108] sm:$0xff]  ;;  %v103_v40 = vld [vmem:[#allocation3 + $0x150] sm:$0xff] }
  0x24   :  { %1885 = vmatpush.bf16.msra.mxu1 %v1800_v6  ;;  %1886 = vmatpush.bf16.msra.mxu2 %v1800_v6  ;;  %v77_v49 = vld [vmem:[#allocation3 + $0x80] sm:$0xff]  ;;  %v102_v38 = vld [vmem:[#allocation3 + $0x148] sm:$0xff]  ;;  %v96_v41 = vld [vmem:[#allocation3 + $0x118] sm:$0xff] }
  0x25   :  { %1887 = vmatpush.bf16.msra.mxu3 %v1800_v6  ;;  %774 = vmatpush.bf16.msra.mxu0 %v1800_v6  ;;  %v85_v50 = vld [vmem:[#allocation3 + $0xc0] sm:$0xff]  ;;  %v1845_v6 = vld [vmem:[#allocation6 + $0x178] sm:$0xff]  ;;  %v1848_v0 = vld [vmem:[#allocation6 + $0x190] sm:$0xff] }
  0x26   :  { %v197_v55 = vpack.c.bf16 %v85_v50, %v77_v49  ;;  %v1814_v60 = vld [vmem:[#allocation6 + $0x80] sm:$0xff]  ;;  %v1849_v49 = vld [vmem:[#allocation6 + $0x198] sm:$0xff]  ;;  %v1856_v1 = vld [vmem:[#allocation6 + $0x1d0] sm:$0xff] }
  0x27   :  { %v1806_v62 = vld [vmem:[#allocation6 + $0x40] sm:$0xff]  ;;  %v1857_v50 = vld [vmem:[#allocation6 + $0x1d8] sm:$0xff]  ;;  %v134_v4 = vld [vmem:[#allocation3 + $0x248] sm:$0xff] }
  0x28   :  { %1888 = vmatpush.bf16.msra.mxu1 %v1799_v7  ;;  %1889 = vmatpush.bf16.msra.mxu2 %v1799_v7  ;;  %v1822_v63 = vld [vmem:[#allocation6 + $0xc0] sm:$0xff]  ;;  %v127_v5 = vld [vmem:[#allocation3 + $0x210] sm:$0xff] }
  0x29   :  { %1890 = vmatpush.bf16.msra.mxu3 %v1799_v7  ;;  %775 = vmatpush.bf16.msra.mxu0 %v1799_v7  ;;  %v64_v7 = vld [vmem:[#allocation3 + $0x18] sm:$0xff]  ;;  %v1830_v9 = vld [vmem:[#allocation6 + $0x100] sm:$0xff] }
  0x2a   :  { %v65_v13 = vld [vmem:[#allocation3 + $0x20] sm:$0xff] }
  0x2b   :  { %v73_v14 = vld [vmem:[#allocation3 + $0x60] sm:$0xff] }
  0x2c   :  { %1891 = vmatpush.bf16.msra.mxu1 %v1798_v8  ;;  %1892 = vmatpush.bf16.msra.mxu2 %v1798_v8  ;;  %v1842_v36 = vld [vmem:[#allocation6 + $0x160] sm:$0xff] }
  0x2d   :  { %1893 = vmatpush.bf16.msra.mxu3 %v1798_v8  ;;  %776 = vmatpush.bf16.msra.mxu0 %v1798_v8  ;;  %v72_v8 = vld [vmem:[#allocation3 + $0x58] sm:$0xff] }
  0x2e   :  { %v192_v12 = vpack.c.bf16 %v72_v8, %v64_v7  ;;  %v128_v7 = vld [vmem:[#allocation3 + $0x218] sm:$0xff] }
  0x2f   :  { %787 = vmatmul.bf16.vlgmr.msra.gmra.mxu1 %v205_v18  ;;  %797 = vmatmul.bf16.vlgmr.msra.gmra.mxu2 %v221_v19  ;;  %v193_v18 = vpack.c.bf16 %v73_v14, %v65_v13  ;;  %v1851_v19 = vld [vmem:[#allocation6 + $0x1a8] sm:$0xff]  ;;  %v136_v8 = vld [vmem:[#allocation3 + $0x258] sm:$0xff]  ;;  %v137_v13 = vld [vmem:[#allocation3 + $0x260] sm:$0xff] }
  0x30   :  { %867 = vmatpush.bf16.msrb.mxu2 %v1821_v15  ;;  %818 = vmatpush.bf16.msrb.mxu1 %v1813_v16  ;;  %v1852_v15 = vld [vmem:[#allocation6 + $0x1b0] sm:$0xff] }
  0x31   :  { %916 = vmatpush.bf16.msrb.mxu3 %v1829_v17  ;;  %965 = vmatpush.bf16.msrb.mxu0 %v1837_v24  ;;  %v1860_v16 = vld [vmem:[#allocation6 + $0x1f0] sm:$0xff] }
  0x32   :  { %807 = vmatmul.bf16.vlgmr.msra.gmra.mxu3 %v237_v20  ;;  %777 = vmatmul.bf16.vlgmr.msra.gmra.mxu0 %v189_v27  ;;  %v1844_v17 = vld [vmem:[#allocation6 + $0x170] sm:$0xff]  ;;  %v1859_v20 = vld [vmem:[#allocation6 + $0x1e8] sm:$0xff]  ;;  %v88_v27 = vld [vmem:[#allocation3 + $0xd8] sm:$0xff] }
  0x33   :  { %v79_v24 = vld [vmem:[#allocation3 + $0x90] sm:$0xff] }
  0x34   :  { %868 = vmatpush.bf16.msrb.mxu2 %v1820_v23  ;;  %819 = vmatpush.bf16.msrb.mxu1 %v1812_v25  ;;  %v86_v23 = vld [vmem:[#allocation3 + $0xc8] sm:$0xff]  ;;  %v87_v25 = vld [vmem:[#allocation3 + $0xd0] sm:$0xff] }
  0x35   :  { %917 = vmatpush.bf16.msrb.mxu3 %v1828_v26  ;;  %966 = vmatpush.bf16.msrb.mxu0 %v1836_v29  ;;  %v80_v26 = vld [vmem:[#allocation3 + $0x98] sm:$0xff]  ;;  %v199_v29 = vpack.c.bf16 %v87_v25, %v79_v24 }
  0x38   :  { %869 = vmatpush.bf16.msrb.mxu2 %v1819_v28  ;;  %820 = vmatpush.bf16.msrb.mxu1 %v1811_v30  ;;  %v198_v28 = vpack.c.bf16 %v86_v23, %v78_v22  ;;  %v200_v30 = vpack.c.bf16 %v88_v27, %v80_v26  ;;  %v144_v22 = vld [vmem:[#allocation3 + $0x298] sm:$0xff]  ;;  %v145_v27 = vld [vmem:[#allocation3 + $0x2a0] sm:$0xff] }
  0x39   :  { %918 = vmatpush.bf16.msrb.mxu3 %v1827_v31  ;;  %967 = vmatpush.bf16.msrb.mxu0 %v1835_v33  ;;  %v81_v31 = vld [vmem:[#allocation3 + $0xa0] sm:$0xff]  ;;  %v152_v23 = vld [vmem:[#allocation3 + $0x2d8] sm:$0xff] }
  0x3a   :  { %v232_v26 = vpack.c.bf16 %v152_v23, %v144_v22 }
  0x3c   :  { %870 = vmatpush.bf16.msrb.mxu2 %v1818_v32  ;;  %821 = vmatpush.bf16.msrb.mxu1 %v1810_v34  ;;  %v89_v32 = vld [vmem:[#allocation3 + $0xe0] sm:$0xff] }
  0x3d   :  { %919 = vmatpush.bf16.msrb.mxu3 %v1826_v35  ;;  %968 = vmatpush.bf16.msrb.mxu0 %v1834_v43  ;;  %v201_v33 = vpack.c.bf16 %v89_v32, %v81_v31  ;;  %v1850_v34 = vld [vmem:[#allocation6 + $0x1a0] sm:$0xff]  ;;  %v206_v43 = vpack.c.bf16 %v102_v38, %v94_v37  ;;  %v160_v37 = vld [vmem:[#allocation3 + $0x318] sm:$0xff] }
  0x3e   :  { %v1858_v35 = vld [vmem:[#allocation6 + $0x1e0] sm:$0xff]  ;;  %v168_v38 = vld [vmem:[#allocation3 + $0x358] sm:$0xff] }
  0x3f   :  { %792 = vmatmul.bf16.gmra.mxu1 %v213_v46  ;;  %802 = vmatmul.bf16.gmra.mxu2 %v229_v47  ;;  %v97_v46 = vld [vmem:[#allocation3 + $0x120] sm:$0xff] }
  0x40   :  { %871 = vmatpush.bf16.msrb.mxu2 %v1817_v42  ;;  %822 = vmatpush.bf16.msrb.mxu1 %v1809_v44  ;;  %v104_v42 = vld [vmem:[#allocation3 + $0x158] sm:$0xff]  ;;  %v207_v44 = vpack.c.bf16 %v103_v40, %v95_v39  ;;  %v105_v47 = vld [vmem:[#allocation3 + $0x160] sm:$0xff] }
  0x41   :  { %920 = vmatpush.bf16.msrb.mxu3 %v1825_v45  ;;  %969 = vmatpush.bf16.msrb.mxu0 %v1833_v52  ;;  %v208_v45 = vpack.c.bf16 %v104_v42, %v96_v41  ;;  %v110_v52 = vld [vmem:[#allocation3 + $0x188] sm:$0xff]  ;;  %v1854_v31 = vld [vmem:[#allocation6 + $0x1c0] sm:$0xff]  ;;  %v240_v42 = vpack.c.bf16 %v168_v38, %v160_v37  ;;  %v83_v38 = vld [vmem:[#allocation3 + $0xb0] sm:$0xff] }
  0x42   :  { %812 = vmatmul.bf16.gmra.mxu3 %v245_v48  ;;  %782 = vmatmul.bf16.gmra.mxu0 %v197_v55  ;;  %v209_v48 = vpack.c.bf16 %v105_v47, %v97_v46  ;;  %v119_v55 = vld [vmem:[#allocation3 + $0x1d0] sm:$0xff]  ;;  %v1838_v32 = vld [vmem:[#allocation6 + $0x140] sm:$0xff]  ;;  %v2045_v46 = vld [vmem:[%s2246_s2] ss:$0 sm:$0xff] }
  0x43   :  { %v90_v37 = vld [vmem:[#allocation3 + $0xe8] sm:$0xff] }
  0x44   :  { %872 = vmatpush.bf16.msrb.mxu2 %v1816_v51  ;;  %823 = vmatpush.bf16.msrb.mxu1 %v1808_v53  ;;  %v1841_v51 = vld [vmem:[#allocation6 + $0x158] sm:$0xff]  ;;  %v118_v53 = vld [vmem:[#allocation3 + $0x1c8] sm:$0xff] }
  0x45   :  { %921 = vmatpush.bf16.msrb.mxu3 %v1824_v54  ;;  %970 = vmatpush.bf16.msrb.mxu0 %v1832_v57  ;;  %v111_v54 = vld [vmem:[#allocation3 + $0x190] sm:$0xff]  ;;  %v120_v57 = vld [vmem:[#allocation3 + $0x1d8] sm:$0xff] }
  0x48   :  { %873 = vmatpush.bf16.msrb.mxu2 %v1815_v56  ;;  %824 = vmatpush.bf16.msrb.mxu1 %v1807_v58  ;;  %v112_v56 = vld [vmem:[#allocation3 + $0x198] sm:$0xff]  ;;  %v214_v58 = vpack.c.bf16 %v118_v53, %v110_v52  ;;  %v174_v52 = vld [vmem:[#allocation3 + $0x388] sm:$0xff] }
  0x49   :  { %922 = vmatpush.bf16.msrb.mxu3 %v1823_v59  ;;  %971 = vmatpush.bf16.msrb.mxu0 %v1831_v61  ;;  %v215_v59 = vpack.c.bf16 %v119_v55, %v111_v54  ;;  %v113_v61 = vld [vmem:[#allocation3 + $0x1a0] sm:$0xff]  ;;  %v182_v53 = vld [vmem:[#allocation3 + $0x3c8] sm:$0xff]  ;;  %v175_v54 = vld [vmem:[#allocation3 + $0x390] sm:$0xff] }
  0x4a   :  { %v183_v55 = vld [vmem:[#allocation3 + $0x3d0] sm:$0xff] }
  0x4c   :  { %874 = vmatpush.bf16.msrb.mxu2 %v1814_v60  ;;  %825 = vmatpush.bf16.msrb.mxu1 %v1806_v62  ;;  %v216_v60 = vpack.c.bf16 %v120_v57, %v112_v56  ;;  %v121_v62 = vld [vmem:[#allocation3 + $0x1e0] sm:$0xff]  ;;  %v176_v56 = vld [vmem:[#allocation3 + $0x398] sm:$0xff] }
  0x4d   :  { %923 = vmatpush.bf16.msrb.mxu3 %v1822_v63  ;;  %972 = vmatpush.bf16.msrb.mxu0 %v1830_v9  ;;  %v217_v63 = vpack.c.bf16 %v121_v62, %v113_v61  ;;  %v184_v57 = vld [vmem:[#allocation3 + $0x3d8] sm:$0xff]  ;;  %v246_v61 = vpack.c.bf16 %v182_v53, %v174_v52  ;;  %v247_v62 = vpack.c.bf16 %v183_v55, %v175_v54 }
  0x4f   :  { %826 = vmatmul.bf16.vlgmr.msrb.gmra.mxu1 %v190_v10  ;;  %875 = vmatmul.bf16.vlgmr.msrb.gmra.mxu2 %v191_v11  ;;  %v224_v11 = vpack.c.bf16 %v136_v8, %v128_v7 }
  0x50   :  { %1063 = vmatpush.bf16.msra.mxu2 %v1853_v2  ;;  %1014 = vmatpush.bf16.msra.mxu1 %v1845_v6  ;;  %v1840_v2 = vld [vmem:[#allocation6 + $0x150] sm:$0xff] }
  0x51   :  { %1112 = vmatpush.bf16.msra.mxu3 %v1861_v3  ;;  %v126_v3 = vld [vmem:[#allocation3 + $0x208] sm:$0xff]  ;;  %v135_v6 = vld [vmem:[#allocation3 + $0x250] sm:$0xff] }
  0x52   :  { %924 = vmatmul.bf16.vlgmr.msrb.gmra.mxu3 %v192_v12  ;;  %973 = vmatmul.bf16.vlgmr.msrb.gmra.mxu0 %v193_v18  ;;  %v222_v9 = vpack.c.bf16 %v134_v4, %v126_v3  ;;  %v223_v10 = vpack.c.bf16 %v135_v6, %v127_v5  ;;  %v129_v12 = vld [vmem:[#allocation3 + $0x220] sm:$0xff]  ;;  %v142_v18 = vld [vmem:[#allocation3 + $0x288] sm:$0xff] }
  0x53   :  { %v225_v14 = vpack.c.bf16 %v137_v13, %v129_v12  ;;  %v185_v3 = vld [vmem:[#allocation3 + $0x3e0] sm:$0xff]  ;;  %v66_v12 = vld [vmem:[#allocation3 + $0x28] sm:$0xff] }
  0x54   :  { %1064 = vmatpush.bf16.msra.mxu2 %v1852_v15  ;;  %1015 = vmatpush.bf16.msra.mxu1 %v1844_v17  ;;  %v1847_v15 = vld [vmem:[#allocation6 + $0x188] sm:$0xff] }
  0x55   :  { %1113 = vmatpush.bf16.msra.mxu3 %v1860_v16  ;;  %v1855_v16 = vld [vmem:[#allocation6 + $0x1c8] sm:$0xff] }
  0x56   :  { %v1839_v17 = vld [vmem:[#allocation6 + $0x148] sm:$0xff] }
  0x57   :  { %v74_v13 = vld [vmem:[#allocation3 + $0x68] sm:$0xff] }
  0x58   :  { %1065 = vmatpush.bf16.msra.mxu2 %v1851_v19  ;;  %1016 = vmatpush.bf16.msra.mxu1 %v1843_v21  ;;  %v150_v19 = vld [vmem:[#allocation3 + $0x2c8] sm:$0xff]  ;;  %v151_v21 = vld [vmem:[#allocation3 + $0x2d0] sm:$0xff]  ;;  %v194_v22 = vpack.c.bf16 %v74_v13, %v66_v12 }
  0x59   :  { %1114 = vmatpush.bf16.msra.mxu3 %v1859_v20  ;;  %v143_v20 = vld [vmem:[#allocation3 + $0x290] sm:$0xff]  ;;  %v230_v24 = vpack.c.bf16 %v150_v19, %v142_v18 }
  0x5a   :  { %v231_v25 = vpack.c.bf16 %v151_v21, %v143_v20  ;;  %v107_v12 = vld [vmem:[#allocation3 + $0x170] sm:$0xff] }
  0x5c   :  { %1066 = vmatpush.bf16.msra.mxu2 %v1850_v34  ;;  %1017 = vmatpush.bf16.msra.mxu1 %v1842_v36  ;;  %v166_v34 = vld [vmem:[#allocation3 + $0x348] sm:$0xff]  ;;  %v167_v36 = vld [vmem:[#allocation3 + $0x350] sm:$0xff] }
  0x5d   :  { %1115 = vmatpush.bf16.msra.mxu3 %v1858_v35  ;;  %v159_v35 = vld [vmem:[#allocation3 + $0x310] sm:$0xff] }
  0x5e   :  { %v239_v40 = vpack.c.bf16 %v167_v36, %v159_v35  ;;  %v1868_v35 = vld [vmem:[%s2247_s3 + $0x30] sm:$0xff] }
  0x5f   :  { %831 = vmatmul.bf16.gmra.mxu1 %v198_v28  ;;  %880 = vmatmul.bf16.gmra.mxu2 %v199_v29  ;;  %v153_v28 = vld [vmem:[#allocation3 + $0x2e0] sm:$0xff]  ;;  %v82_v36 = vld [vmem:[#allocation3 + $0xa8] sm:$0xff] }
  0x60   :  { %1067 = vmatpush.bf16.msra.mxu2 %v1849_v49  ;;  %1018 = vmatpush.bf16.msra.mxu1 %v1841_v51  ;;  %v233_v29 = vpack.c.bf16 %v153_v28, %v145_v27  ;;  %v202_v53 = vpack.c.bf16 %v90_v37, %v82_v36  ;;  %v114_v36 = vld [vmem:[#allocation3 + $0x1a8] sm:$0xff] }
  0x61   :  { %1116 = vmatpush.bf16.msra.mxu3 %v1857_v50  ;;  %v122_v37 = vld [vmem:[#allocation3 + $0x1e8] sm:$0xff] }
  0x62   :  { %929 = vmatmul.bf16.gmra.mxu3 %v200_v30  ;;  %978 = vmatmul.bf16.gmra.mxu0 %v201_v33  ;;  %v1846_v30 = vld [vmem:[#allocation6 + $0x180] sm:$0xff]  ;;  %v158_v33 = vld [vmem:[#allocation3 + $0x308] sm:$0xff] }
  0x63   :  { %v238_v39 = vpack.c.bf16 %v166_v34, %v158_v33 }
  0x64   :  { %1068 = vmatpush.bf16.msra.mxu2 %v1848_v0  ;;  %1019 = vmatpush.bf16.msra.mxu1 %v1840_v2  ;;  %v177_v2 = vld [vmem:[#allocation3 + $0x3a0] sm:$0xff] }
  0x65   :  { %1117 = vmatpush.bf16.msra.mxu3 %v1856_v1  ;;  %v248_v1 = vpack.c.bf16 %v184_v57, %v176_v56  ;;  %v249_v4 = vpack.c.bf16 %v185_v3, %v177_v2 }
  0x68   :  { %1069 = vmatpush.bf16.msra.mxu2 %v1847_v15  ;;  %1020 = vmatpush.bf16.msra.mxu1 %v1839_v17  ;;  %v75_v15 = vld [vmem:[#allocation3 + $0x70] sm:$0xff]  ;;  %v76_v17 = vld [vmem:[#allocation3 + $0x78] sm:$0xff] }
  0x69   :  { %1118 = vmatpush.bf16.msra.mxu3 %v1855_v16  ;;  %v68_v16 = vld [vmem:[#allocation3 + $0x38] sm:$0xff] }
  0x6c   :  { %1070 = vmatpush.bf16.msra.mxu2 %v1846_v30  ;;  %1021 = vmatpush.bf16.msra.mxu1 %v1838_v32 }
  0x6d   :  { %1119 = vmatpush.bf16.msra.mxu3 %v1854_v31 }
  0x6f   :  { %836 = vmatmul.bf16.gmra.mxu1 %v206_v43  ;;  %885 = vmatmul.bf16.gmra.mxu2 %v207_v44  ;;  %v161_v43 = vld [vmem:[#allocation3 + $0x320] sm:$0xff] }
  0x70   :  { %v169_v44 = vld [vmem:[#allocation3 + $0x360] sm:$0xff] }
  0x72   :  { %934 = vmatmul.bf16.gmra.mxu3 %v208_v45  ;;  %983 = vmatmul.bf16.gmra.mxu0 %v209_v48  ;;  %v241_v45 = vpack.c.bf16 %v169_v44, %v161_v43  ;;  %v92_v43 = vld [vmem:[#allocation3 + $0xf8] sm:$0xff] }
  0x7f   :  { %841 = vmatmul.bf16.gmra.mxu1 %v214_v58  ;;  %890 = vmatmul.bf16.gmra.mxu2 %v215_v59 }
  0x82   :  { %939 = vmatmul.bf16.gmra.mxu3 %v216_v60  ;;  %988 = vmatmul.bf16.gmra.mxu0 %v217_v63 }
  0x8f   :  { %846 = vmatmul.bf16.gmra.mxu1 %v222_v9  ;;  %895 = vmatmul.bf16.gmra.mxu2 %v223_v10  ;;  %v1869_v10 = vld [vmem:[%s2247_s3 + $0x38] sm:$0xff] }
  0x90   :  { %1253 = vmatpush.bf16.msra.mxu0 %v1869_v10  ;;  %v106_v10 = vld [vmem:[#allocation3 + $0x168] sm:$0xff] }
  0x92   :  { %944 = vmatmul.bf16.gmra.mxu3 %v224_v11  ;;  %993 = vmatmul.bf16.gmra.mxu0 %v225_v14  ;;  %v67_v14 = vld [vmem:[#allocation3 + $0x30] sm:$0xff] }
  0x93   :  { %v195_v23 = vpack.c.bf16 %v75_v15, %v67_v14  ;;  %v100_v14 = vld [vmem:[#allocation3 + $0x138] sm:$0xff] }
  0x94   :  { %1254 = vmatpush.bf16.msra.mxu0 %v1868_v35  ;;  %v108_v15 = vld [vmem:[#allocation3 + $0x178] sm:$0xff] }
  0x95   :  { %v1866_v35 = vld [vmem:[%s2247_s3 + $0x20] sm:$0xff] }
  0x9f   :  { %851 = vmatmul.bf16.gmra.mxu1 %v230_v24  ;;  %900 = vmatmul.bf16.gmra.mxu2 %v231_v25 }
  0xa2   :  { %949 = vmatmul.bf16.gmra.mxu3 %v232_v26  ;;  %998 = vmatmul.bf16.gmra.mxu0 %v233_v29  ;;  %v196_v26 = vpack.c.bf16 %v76_v17, %v68_v16 }
  0xac   :  { %v2040_v41 = vpop.f32.mrf.mxu1 }
  0xad   :  { %v789_v17 = vadd.f32 %v2045_v46, %v2040_v41 }
  0xaf   :  { %856 = vmatmul.bf16.gmra.mxu1 %v238_v39  ;;  %905 = vmatmul.bf16.gmra.mxu2 %v239_v40  ;;  %v778_v11 = vpop.f32.mrf.mxu0  ;;  %v91_v39 = vld [vmem:[#allocation3 + $0xf0] sm:$0xff] }
  0xb0   :  { %v779_v19 = vadd.f32 %v2045_v46, %v778_v11  ;;  %v203_v54 = vpack.c.bf16 %v91_v39, %v83_v38  ;;  %v99_v11 = vld [vmem:[#allocation3 + $0x130] sm:$0xff] }
  0xb1   :  { %v115_v38 = vld [vmem:[#allocation3 + $0x1b0] sm:$0xff] }
  0xb2   :  { %954 = vmatmul.bf16.gmra.mxu3 %v240_v42  ;;  %v798_v47 = vpop.f32.mrf.mxu2  ;;  %1003 = vmatmul.bf16.gmra.mxu0 %v241_v45  ;;  %v84_v42 = vld [vmem:[#allocation3 + $0xb8] sm:$0xff]  ;;  %v123_v39 = vld [vmem:[#allocation3 + $0x1f0] sm:$0xff] }
  0xb3   :  { %v2048_v48 = vadd.f32 %v2045_v46, %v798_v47  ;;  %v204_v56 = vpack.c.bf16 %v92_v43, %v84_v42  ;;  %v124_v42 = vld [vmem:[#allocation3 + $0x1f8] sm:$0xff] }
  0xb4   :  { %v2053_v51 = vpop.f32.mrf.mxu1 }
  0xb5   :  { %v808_v49 = vpop.f32.mrf.mxu3 }
  0xb6   :  { %v2051_v50 = vadd.f32 %v2045_v46, %v808_v49 }
  0xb7   :  { %v780_v28 = vpop.f32.mrf.mxu0 }
  0xb8   :  { %v781_v33 = vadd.f32 %v2045_v46, %v780_v28 }
  0xba   :  { %v800_v58 = vpop.f32.mrf.mxu2 }
  0xbb   :  { %v2056_v59 = vadd.f32 %v2045_v46, %v800_v58 }
  0xbc   :  { %v2061_v0 = vpop.f32.mrf.mxu1 }
  0xbd   :  { %v810_v60 = vpop.f32.mrf.mxu3 }
  0xbe   :  { %v2059_v63 = vadd.f32 %v2045_v46, %v810_v60 }
  0xbf   :  { %861 = vmatmul.bf16.gmra.mxu1 %v246_v61  ;;  %910 = vmatmul.bf16.gmra.mxu2 %v247_v62  ;;  %v783_v44 = vpop.f32.mrf.mxu0 }
  0xc0   :  { %v784_v47 = vadd.f32 %v2045_v46, %v783_v44 }
  0xc2   :  { %959 = vmatmul.bf16.gmra.mxu3 %v248_v1  ;;  %v803_v5 = vpop.f32.mrf.mxu2  ;;  %1008 = vmatmul.bf16.gmra.mxu0 %v249_v4 }
  0xc3   :  { %v2064_v6 = vadd.f32 %v2045_v46, %v803_v5  ;;  %v1867_v5 = vld [vmem:[%s2247_s3 + $0x28] sm:$0xff] }
  0xc4   :  { %v2069_v9 = vpop.f32.mrf.mxu1  ;;  %1255 = vmatpush.bf16.msra.mxu0 %v1867_v5  ;;  %v138_v5 = vld [vmem:[#allocation3 + $0x268] sm:$0xff] }
  0xc5   :  { %v813_v7 = vpop.f32.mrf.mxu3 }
  0xc6   :  { %v2067_v8 = vadd.f32 %v2045_v46, %v813_v7  ;;  %v98_v7 = vld [vmem:[#allocation3 + $0x128] sm:$0xff] }
  0xc7   :  { %v785_v1 = vpop.f32.mrf.mxu0 }
  0xc8   :  { %v786_v3 = vadd.f32 %v2045_v46, %v785_v1  ;;  %1256 = vmatpush.bf16.msra.mxu0 %v1866_v35  ;;  %v156_v35 = vld [vmem:[#allocation3 + $0x2f8] sm:$0xff] }
  0xca   :  { %v805_v18 = vpop.f32.mrf.mxu2 }
  0xcb   :  { %v2076_v20 = vadd.f32 %v2045_v46, %v805_v18 }
  0xcc   :  { %v827_v25 = vpop.f32.mrf.mxu1 }
  0xcd   :  { %v815_v21 = vpop.f32.mrf.mxu3  ;;  %v828_v27 = vadd.f32 %v827_v25, %v779_v19  ;;  %v212_v25 = vpack.c.bf16 %v108_v15, %v100_v14 }
  0xce   :  { %v2079_v24 = vadd.f32 %v2045_v46, %v815_v21  ;;  %v210_v21 = vpack.c.bf16 %v106_v10, %v98_v7  ;;  %v131_v7 = vld [vmem:[#allocation3 + $0x230] sm:$0xff] }
  0xcf   :  { %1022 = vmatmul.bf16.vlgmr.msra.gmra.mxu1 %v194_v22  ;;  %1071 = vmatmul.bf16.vlgmr.msra.gmra.mxu2 %v195_v23  ;;  %v211_v22 = vpack.c.bf16 %v107_v12, %v99_v11  ;;  %v139_v10 = vld [vmem:[#allocation3 + $0x270] sm:$0xff]  ;;  %v132_v11 = vld [vmem:[#allocation3 + $0x238] sm:$0xff] }
  0xd0   :  { %v140_v12 = vld [vmem:[#allocation3 + $0x278] sm:$0xff]  ;;  %v227_v15 = vpack.c.bf16 %v139_v10, %v131_v7 }
  0xd2   :  { %1120 = vmatmul.bf16.vlgmr.msra.gmra.mxu3 %v196_v26  ;;  %v876_v29 = vpop.f32.mrf.mxu2 }
  0xd3   :  { %v877_v30 = vadd.f32 %v876_v29, %v828_v27  ;;  %v791_v29 = vadd.f32 %v2045_v46, %v2053_v51  ;;  %v794_v51 = vadd.f32 %v2045_v46, %v2061_v0 }
  0xd4   :  { %v829_v32 = vpop.f32.mrf.mxu1 }
  0xd5   :  { %v925_v31 = vpop.f32.mrf.mxu3  ;;  %v830_v40 = vadd.f32 %v829_v32, %v781_v33 }
  0xd6   :  { %v2082_v34 = vadd.f32 %v925_v31, %v877_v30 }
  0xda   :  { %v878_v45 = vpop.f32.mrf.mxu2 }
  0xdb   :  { %v879_v49 = vadd.f32 %v878_v45, %v830_v40  ;;  %v116_v40 = vld [vmem:[#allocation3 + $0x1b8] sm:$0xff] }
  0xdc   :  { %v832_v55 = vpop.f32.mrf.mxu1 }
  0xdd   :  { %v927_v52 = vpop.f32.mrf.mxu3  ;;  %v833_v58 = vadd.f32 %v832_v55, %v784_v47  ;;  %v218_v47 = vpack.c.bf16 %v122_v37, %v114_v36 }
  0xde   :  { %v2088_v57 = vadd.f32 %v927_v52, %v879_v49  ;;  %v219_v49 = vpack.c.bf16 %v123_v39, %v115_v38 }
  0xdf   :  { %1027 = vmatmul.bf16.gmra.mxu1 %v202_v53  ;;  %1076 = vmatmul.bf16.gmra.mxu2 %v203_v54  ;;  %v220_v53 = vpack.c.bf16 %v124_v42, %v116_v40 }
  0xe2   :  { %1125 = vmatmul.bf16.gmra.mxu3 %v204_v56  ;;  %v881_v60 = vpop.f32.mrf.mxu2 }
  0xe3   :  { %v882_v61 = vadd.f32 %v881_v60, %v833_v58  ;;  %v796_v58 = vadd.f32 %v2045_v46, %v2069_v9 }
  0xe4   :  { %v834_v2 = vpop.f32.mrf.mxu1 }
  0xe5   :  { %v930_v62 = vpop.f32.mrf.mxu3  ;;  %v835_v13 = vadd.f32 %v834_v2, %v786_v3  ;;  %v1865_v2 = vld [vmem:[%s2247_s3 + $0x18] sm:$0xff]  ;;  %v130_v3 = vld [vmem:[#allocation3 + $0x228] sm:$0xff] }
  0xe6   :  { %v2091_v4 = vadd.f32 %v930_v62, %v882_v61  ;;  %1257 = vmatpush.bf16.msra.mxu0 %v1865_v2  ;;  %v226_v9 = vpack.c.bf16 %v138_v5, %v130_v3 }
  0xea   :  { %v883_v16 = vpop.f32.mrf.mxu2 }
  0xeb   :  { %v884_v18 = vadd.f32 %v883_v16, %v835_v13 }
  0xec   :  { %v837_v23 = vpop.f32.mrf.mxu1 }
  0xed   :  { %v932_v19 = vpop.f32.mrf.mxu3  ;;  %v838_v27 = vadd.f32 %v837_v23, %v789_v17  ;;  %v228_v17 = vpack.c.bf16 %v140_v12, %v132_v11 }
  0xee   :  { %v2098_v26 = vadd.f32 %v932_v19, %v884_v18 }
  0xef   :  { %1032 = vmatmul.bf16.gmra.mxu1 %v210_v21  ;;  %1081 = vmatmul.bf16.gmra.mxu2 %v211_v22 }
  0xf2   :  { %1130 = vmatmul.bf16.gmra.mxu3 %v212_v25  ;;  %v886_v28 = vpop.f32.mrf.mxu2 }
  0xf3   :  { %v887_v30 = vadd.f32 %v886_v28, %v838_v27 }
  0xf4   :  { %v839_v32 = vpop.f32.mrf.mxu1 }
  0xf5   :  { %v935_v31 = vpop.f32.mrf.mxu3  ;;  %v840_v33 = vadd.f32 %v839_v32, %v791_v29  ;;  %v1864_v29 = vld [vmem:[%s2247_s3 + $0x10] sm:$0xff] }
  0xf6   :  { %v2102_v41 = vadd.f32 %v935_v31, %v887_v30  ;;  %v146_v30 = vld [vmem:[#allocation3 + $0x2a8] sm:$0xff]  ;;  %1258 = vmatpush.bf16.msra.mxu0 %v1864_v29  ;;  %v147_v32 = vld [vmem:[#allocation3 + $0x2b0] sm:$0xff]  ;;  %v188_v29 = vld [vmem:[#allocation3 + $0x3f8] sm:$0xff] }
  0xf7   :  { %v154_v31 = vld [vmem:[#allocation3 + $0x2e8] sm:$0xff] }
  0xf8   :  { %v234_v39 = vpack.c.bf16 %v154_v31, %v146_v30 }
  0xfa   :  { %v888_v43 = vpop.f32.mrf.mxu2 }
  0xfb   :  { %v889_v44 = vadd.f32 %v888_v43, %v840_v33  ;;  %v148_v33 = vld [vmem:[#allocation3 + $0x2b8] sm:$0xff] }
  0xfc   :  { %v842_v52 = vpop.f32.mrf.mxu1  ;;  %v236_v43 = vpack.c.bf16 %v156_v35, %v148_v33 }
  0xfd   :  { %v937_v45 = vpop.f32.mrf.mxu3  ;;  %v843_v55 = vadd.f32 %v842_v52, %v794_v51 }
  0xfe   :  { %v2109_v54 = vadd.f32 %v937_v45, %v889_v44 }
  0xff   :  { %1037 = vmatmul.bf16.gmra.mxu1 %v218_v47  ;;  %1086 = vmatmul.bf16.gmra.mxu2 %v219_v49 }
 0x102   :  { %1135 = vmatmul.bf16.gmra.mxu3 %v220_v53  ;;  %v891_v56 = vpop.f32.mrf.mxu2 }
 0x103   :  { %v892_v60 = vadd.f32 %v891_v56, %v843_v55  ;;  %v1863_v55 = vld [vmem:[%s2247_s3 + $0x8] sm:$0xff] }
 0x104   :  { %v844_v62 = vpop.f32.mrf.mxu1  ;;  %v162_v56 = vld [vmem:[#allocation3 + $0x328] sm:$0xff]  ;;  %1259 = vmatpush.bf16.msra.mxu0 %v1863_v55 }
 0x105   :  { %v940_v61 = vpop.f32.mrf.mxu3  ;;  %v845_v1 = vadd.f32 %v844_v62, %v796_v58  ;;  %v170_v58 = vld [vmem:[#allocation3 + $0x368] sm:$0xff]  ;;  %v172_v62 = vld [vmem:[#allocation3 + $0x378] sm:$0xff] }
 0x106   :  { %v2113_v0 = vadd.f32 %v940_v61, %v892_v60  ;;  %v163_v60 = vld [vmem:[#allocation3 + $0x330] sm:$0xff]  ;;  %v164_v61 = vld [vmem:[#allocation3 + $0x338] sm:$0xff]  ;;  %v242_v5 = vpack.c.bf16 %v170_v58, %v162_v56 }
 0x107   :  { %v244_v11 = vpack.c.bf16 %v172_v62, %v164_v61 }
 0x10a   :  { %v893_v13 = vpop.f32.mrf.mxu2 }
 0x10b   :  { %v894_v14 = vadd.f32 %v893_v13, %v845_v1  ;;  %v974_v13 = vpop.f32.mrf.mxu0 }
 0x10c   :  { %v847_v16 = vpop.f32.mrf.mxu1  ;;  %v975_v58 = vadd.f32 %v974_v13, %v2082_v34 }
 0x10d   :  { %v942_v46 = vpop.f32.mrf.mxu3  ;;  %v848_v19 = vadd.f32 %v847_v16, %v2048_v48  ;;  %v155_v48 = vld [vmem:[#allocation3 + $0x2f0] sm:$0xff] }
 0x10e   :  { %v2118_v18 = vadd.f32 %v942_v46, %v894_v14  ;;  %v235_v40 = vpack.c.bf16 %v155_v48, %v147_v32 }
 0x10f   :  { %1042 = vmatmul.bf16.gmra.mxu1 %v226_v9  ;;  %1091 = vmatmul.bf16.gmra.mxu2 %v227_v15 }
 0x112   :  { %1140 = vmatmul.bf16.gmra.mxu3 %v228_v17  ;;  %v896_v21 = vpop.f32.mrf.mxu2 }
 0x113   :  { %v897_v22 = vadd.f32 %v896_v21, %v848_v19  ;;  %v178_v19 = vld [vmem:[#allocation3 + $0x3a8] sm:$0xff]  ;;  %v1862_v21 = vld [vmem:[%s2247_s3] sm:$0xff] }
 0x114   :  { %v849_v25 = vpop.f32.mrf.mxu1  ;;  %1260 = vmatpush.bf16.msra.mxu0 %v1862_v21 }
 0x115   :  { %v945_v23 = vpop.f32.mrf.mxu3  ;;  %v850_v28 = vadd.f32 %v849_v25, %v2056_v59  ;;  %v187_v25 = vld [vmem:[#allocation3 + $0x3f0] sm:$0xff] }
 0x116   :  { %v2121_v27 = vadd.f32 %v945_v23, %v897_v22  ;;  %v976_v22 = vpop.f32.mrf.mxu0  ;;  %v186_v23 = vld [vmem:[#allocation3 + $0x3e8] sm:$0xff] }
 0x117   :  { %v250_v48 = vpack.c.bf16 %v186_v23, %v178_v19 }
 0x11a   :  { %v898_v36 = vpop.f32.mrf.mxu2 }
 0x11b   :  { %v899_v37 = vadd.f32 %v898_v36, %v850_v28  ;;  %v180_v28 = vld [vmem:[#allocation3 + $0x3b8] sm:$0xff] }
 0x11c   :  { %v852_v42 = vpop.f32.mrf.mxu1  ;;  %v252_v36 = vpack.c.bf16 %v188_v29, %v180_v28 }
 0x11d   :  { %v947_v38 = vpop.f32.mrf.mxu3  ;;  %v853_v59 = vadd.f32 %v852_v42, %v2064_v6  ;;  %v171_v6 = vld [vmem:[#allocation3 + $0x370] sm:$0xff] }
 0x11e   :  { %v2127_v51 = vadd.f32 %v947_v38, %v899_v37  ;;  %v243_v7 = vpack.c.bf16 %v171_v6, %v163_v60  ;;  %v979_v38 = vpop.f32.mrf.mxu0 }
 0x11f   :  { %1047 = vmatmul.bf16.gmra.mxu1 %v234_v39  ;;  %1096 = vmatmul.bf16.gmra.mxu2 %v235_v40  ;;  %v980_v34 = vadd.f32 %v979_v38, %v2091_v4 }
 0x122   :  { %1145 = vmatmul.bf16.gmra.mxu3 %v236_v43  ;;  %v901_v44 = vpop.f32.mrf.mxu2 }
 0x123   :  { %v902_v45 = vadd.f32 %v901_v44, %v853_v59 }
 0x124   :  { %v854_v49 = vpop.f32.mrf.mxu1 }
 0x125   :  { %v950_v47 = vpop.f32.mrf.mxu3  ;;  %v855_v53 = vadd.f32 %v854_v49, %v2076_v20 }
 0x126   :  { %v2130_v52 = vadd.f32 %v950_v47, %v902_v45 }
 0x12a   :  { %v903_v1 = vpop.f32.mrf.mxu2 }
 0x12b   :  { %v904_v2 = vadd.f32 %v903_v1, %v855_v53  ;;  %v981_v53 = vpop.f32.mrf.mxu0  ;;  %v977_v1 = vadd.f32 %v976_v22, %v2088_v57 }
 0x12c   :  { %v857_v10 = vpop.f32.mrf.mxu1  ;;  %v982_v57 = vadd.f32 %v981_v53, %v2098_v26 }
 0x12d   :  { %v952_v3 = vpop.f32.mrf.mxu3  ;;  %v858_v20 = vadd.f32 %v857_v10, %v2051_v50  ;;  %v179_v50 = vld [vmem:[#allocation3 + $0x3b0] sm:$0xff] }
 0x12e   :  { %v2136_v12 = vadd.f32 %v952_v3, %v904_v2  ;;  %v251_v33 = vpack.c.bf16 %v187_v25, %v179_v50 }
 0x12f   :  { %1052 = vmatmul.bf16.gmra.mxu1 %v242_v5  ;;  %1101 = vmatmul.bf16.gmra.mxu2 %v243_v7 }
 0x132   :  { %1150 = vmatmul.bf16.gmra.mxu3 %v244_v11  ;;  %v906_v14 = vpop.f32.mrf.mxu2 }
 0x133   :  { %v907_v46 = vadd.f32 %v906_v14, %v858_v20  ;;  %v984_v62 = vpop.f32.mrf.mxu0 }
 0x134   :  { %v859_v15 = vpop.f32.mrf.mxu1  ;;  %v985_v4 = vadd.f32 %v984_v62, %v2102_v41 }
 0x135   :  { %v955_v9 = vpop.f32.mrf.mxu3  ;;  %v860_v17 = vadd.f32 %v859_v15, %v2059_v63 }
 0x136   :  { %v2139_v16 = vadd.f32 %v955_v9, %v907_v46 }
 0x13a   :  { %v908_v30 = vpop.f32.mrf.mxu2 }
 0x13b   :  { %v909_v31 = vadd.f32 %v908_v30, %v860_v17  ;;  %v986_v9 = vpop.f32.mrf.mxu0 }
 0x13c   :  { %v862_v35 = vpop.f32.mrf.mxu1 }
 0x13d   :  { %v957_v32 = vpop.f32.mrf.mxu3  ;;  %v863_v37 = vadd.f32 %v862_v35, %v2067_v8 }
 0x13e   :  { %v2145_v63 = vadd.f32 %v957_v32, %v909_v31 }
 0x13f   :  { %1057 = vmatmul.bf16.gmra.mxu1 %v250_v48  ;;  %1106 = vmatmul.bf16.gmra.mxu2 %v251_v33 }
 0x142   :  { %1155 = vmatmul.bf16.gmra.mxu3 %v252_v36  ;;  %v911_v39 = vpop.f32.mrf.mxu2 }
 0x143   :  { %v912_v40 = vadd.f32 %v911_v39, %v863_v37  ;;  %v989_v50 = vpop.f32.mrf.mxu0 }
 0x144   :  { %v864_v43 = vpop.f32.mrf.mxu1 }
 0x145   :  { %v960_v42 = vpop.f32.mrf.mxu3  ;;  %v865_v44 = vadd.f32 %v864_v43, %v2079_v24 }
 0x146   :  { %v2148_v59 = vadd.f32 %v960_v42, %v912_v40  ;;  %v987_v40 = vadd.f32 %v986_v9, %v2109_v54 }
 0x14a   :  { %v913_v45 = vpop.f32.mrf.mxu2 }
 0x14b   :  { %v914_v47 = vadd.f32 %v913_v45, %v865_v44  ;;  %v991_v38 = vpop.f32.mrf.mxu0 }
 0x14c   :  { %v1023_v55 = vpop.f32.mrf.mxu1  ;;  %v992_v54 = vadd.f32 %v991_v38, %v2118_v18 }
 0x14d   :  { %v962_v49 = vpop.f32.mrf.mxu3  ;;  %v1024_v61 = vadd.f32 %v1023_v55, %v975_v58 }
 0x14e   :  { %v2151_v56 = vadd.f32 %v962_v49, %v914_v47 }
 0x152   :  { %v1072_v8 = vpop.f32.mrf.mxu2 }
 0x153   :  { %v1073_v2 = vadd.f32 %v1072_v8, %v1024_v61  ;;  %v994_v8 = vpop.f32.mrf.mxu0  ;;  %v990_v61 = vadd.f32 %v989_v50, %v2113_v0 }
 0x154   :  { %v1025_v6 = vpop.f32.mrf.mxu1 }
 0x155   :  { %v1121_v60 = vpop.f32.mrf.mxu3  ;;  %v1026_v3 = vadd.f32 %v1025_v6, %v977_v1 }
 0x156   :  { %v1122_v24 = vadd.f32 %v1121_v60, %v1073_v2 }
 0x158   :  { %v1161_v14 = vmax.f32 %v1122_v24, 0.0 }
 0x15a   :  { %v1074_v5 = vpop.f32.mrf.mxu2 }
 0x15b   :  { %v1075_v7 = vadd.f32 %v1074_v5, %v1026_v3  ;;  %v996_v5 = vpop.f32.mrf.mxu0 }
 0x15c   :  { %v1028_v11 = vpop.f32.mrf.mxu1 }
 0x15d   :  { %v1123_v10 = vpop.f32.mrf.mxu3  ;;  %v1029_v21 = vadd.f32 %v1028_v11, %v980_v34 }
 0x15e   :  { %v1124_v20 = vadd.f32 %v1123_v10, %v1075_v7 }
 0x160   :  { %v1162_v46 = vmax.f32 %v1124_v20, 0.0 }
 0x162   :  { %v1177_v15 = vpack.c.bf16 %v1162_v46, %v1161_v14  ;;  %v1077_v17 = vpop.f32.mrf.mxu2 }
 0x163   :  { %v1078_v22 = vadd.f32 %v1077_v17, %v1029_v21  ;;  %v999_v34 = vpop.f32.mrf.mxu0 }
 0x164   :  { %1261 = vmatmul.bf16.vlgmr.msra.gmra.mxu0 %v1177_v15  ;;  %v1030_v19 = vpop.f32.mrf.mxu1 }
 0x165   :  { %v1126_v13 = vpop.f32.mrf.mxu3  ;;  %v1031_v23 = vadd.f32 %v1030_v19, %v982_v57  ;;  %v997_v57 = vadd.f32 %v996_v5, %v2127_v51 }
 0x166   :  { %v1127_v28 = vadd.f32 %v1126_v13, %v1078_v22  ;;  %v995_v13 = vadd.f32 %v994_v8, %v2121_v27  ;;  %v1000_v27 = vadd.f32 %v999_v34, %v2130_v52 }
 0x168   :  { %v1163_v48 = vmax.f32 %v1127_v28, 0.0 }
 0x16a   :  { %v1079_v25 = vpop.f32.mrf.mxu2 }
 0x16b   :  { %v1080_v29 = vadd.f32 %v1079_v25, %v1031_v23 }
 0x16c   :  { %v1033_v31 = vpop.f32.mrf.mxu1 }
 0x16d   :  { %v1128_v30 = vpop.f32.mrf.mxu3  ;;  %v1034_v26 = vadd.f32 %v1033_v31, %v985_v4 }
 0x16e   :  { %v1129_v32 = vadd.f32 %v1128_v30, %v1080_v29  ;;  %v1001_v30 = vpop.f32.mrf.mxu0 }
 0x170   :  { %v1164_v33 = vmax.f32 %v1129_v32, 0.0 }
 0x172   :  { %v1178_v35 = vpack.c.bf16 %v1164_v33, %v1163_v48  ;;  %v1082_v36 = vpop.f32.mrf.mxu2 }
 0x173   :  { %v1083_v42 = vadd.f32 %v1082_v36, %v1034_v26 }
 0x174   :  { %1266 = vmatmul.bf16.gmra.mxu0 %v1178_v35  ;;  %v1035_v39 = vpop.f32.mrf.mxu1 }
 0x175   :  { %v1131_v37 = vpop.f32.mrf.mxu3  ;;  %v1036_v43 = vadd.f32 %v1035_v39, %v987_v40  ;;  %v1002_v39 = vadd.f32 %v1001_v30, %v2136_v12 }
 0x176   :  { %v1132_v45 = vadd.f32 %v1131_v37, %v1083_v42  ;;  %v1004_v51 = vpop.f32.mrf.mxu0 }
 0x178   :  { %v1165_v58 = vmax.f32 %v1132_v45, 0.0 }
 0x17a   :  { %v1084_v44 = vpop.f32.mrf.mxu2 }
 0x17b   :  { %v1085_v47 = vadd.f32 %v1084_v44, %v1036_v43 }
 0x17c   :  { %v1038_v53 = vpop.f32.mrf.mxu1 }
 0x17d   :  { %v1133_v49 = vpop.f32.mrf.mxu3  ;;  %v1039_v2 = vadd.f32 %v1038_v53, %v990_v61 }
 0x17e   :  { %v1134_v55 = vadd.f32 %v1133_v49, %v1085_v47  ;;  %v1006_v8 = vpop.f32.mrf.mxu0 }
 0x17f   :  { %v1007_v12 = vadd.f32 %v1006_v8, %v2145_v63  ;;  %v1358_v8 = vld [vmem:[%s2249_s5 + $0x40] sm:$0xff] }
 0x180   :  { %v1166_v60 = vmax.f32 %v1134_v55, 0.0 }
 0x182   :  { %v1179_v6 = vpack.c.bf16 %v1166_v60, %v1165_v58  ;;  %v1087_v41 = vpop.f32.mrf.mxu2  ;;  %v1005_v60 = vadd.f32 %v1004_v51, %v2139_v16  ;;  %v1351_v51 = vld [vmem:[%s2249_s5 + $0x8] sm:$0xff] }
 0x183   :  { %v1088_v3 = vadd.f32 %v1087_v41, %v1039_v2 }
 0x184   :  { %1271 = vmatmul.bf16.gmra.mxu0 %v1179_v6  ;;  %v1040_v1 = vpop.f32.mrf.mxu1 }
 0x185   :  { %v1136_v62 = vpop.f32.mrf.mxu3  ;;  %v1041_v24 = vadd.f32 %v1040_v1, %v992_v54 }
 0x186   :  { %v1137_v10 = vadd.f32 %v1136_v62, %v1088_v3  ;;  %v1009_v2 = vpop.f32.mrf.mxu0 }
 0x187   :  { %v1010_v16 = vadd.f32 %v1009_v2, %v2148_v59  ;;  %v2172_v59 = vld [vmem:[%s2248_s4] ss:$0 sm:$0xff] }
 0x188   :  { %v1167_v9 = vmax.f32 %v1137_v10, 0.0  ;;  %v1362_v2 = vld [vmem:[%s2249_s5 + $0x60] sm:$0xff] }
 0x18a   :  { %v1089_v7 = vpop.f32.mrf.mxu2 }
 0x18b   :  { %v1090_v11 = vadd.f32 %v1089_v7, %v1041_v24 }
 0x18c   :  { %v1043_v14 = vpop.f32.mrf.mxu1 }
 0x18d   :  { %v1138_v20 = vpop.f32.mrf.mxu3  ;;  %v1044_v18 = vadd.f32 %v1043_v14, %v995_v13 }
 0x18e   :  { %v1139_v46 = vadd.f32 %v1138_v20, %v1090_v11 }
 0x190   :  { %v1168_v15 = vmax.f32 %v1139_v46, 0.0 }
 0x192   :  { %v1180_v17 = vpack.c.bf16 %v1168_v15, %v1167_v9  ;;  %v1092_v0 = vpop.f32.mrf.mxu2  ;;  %v1011_v15 = vpop.f32.mrf.mxu0 }
 0x193   :  { %v1093_v22 = vadd.f32 %v1092_v0, %v1044_v18  ;;  %v1012_v34 = vadd.f32 %v1011_v15, %v2151_v56 }
 0x194   :  { %1276 = vmatmul.bf16.gmra.mxu0 %v1180_v17  ;;  %v1045_v21 = vpop.f32.mrf.mxu1 }
 0x195   :  { %v1141_v19 = vpop.f32.mrf.mxu3  ;;  %v1046_v23 = vadd.f32 %v1045_v21, %v997_v57 }
 0x196   :  { %v1142_v25 = vadd.f32 %v1141_v19, %v1093_v22 }
 0x198   :  { %v1169_v48 = vmax.f32 %v1142_v25, 0.0 }
 0x19a   :  { %v1094_v50 = vpop.f32.mrf.mxu2 }
 0x19b   :  { %v1095_v28 = vadd.f32 %v1094_v50, %v1046_v23 }
 0x19c   :  { %v1048_v31 = vpop.f32.mrf.mxu1 }
 0x19d   :  { %v1143_v29 = vpop.f32.mrf.mxu3  ;;  %v1049_v38 = vadd.f32 %v1048_v31, %v1000_v27  ;;  %v1989_v27 = vmov 0  }
 0x19e   :  { %v1144_v32 = vadd.f32 %v1143_v29, %v1095_v28  ;;  %1901 = vset.pattern.permute.xlu1 %v1989_v27  ;;  %1902 = vset.pattern.permute.xlu2 %v1989_v27 }
 0x1a0   :  { %v1170_v33 = vmax.f32 %v1144_v32, 0.0 }
 0x1a2   :  { %v1181_v35 = vpack.c.bf16 %v1170_v33, %v1169_v48  ;;  %v1097_v36 = vpop.f32.mrf.mxu2 }
 0x1a3   :  { %v1098_v26 = vadd.f32 %v1097_v36, %v1049_v38  ;;  %v1350_v36 = vld [vmem:[%s2249_s5] sm:$0xff] }
 0x1a4   :  { %1281 = vmatmul.bf16.gmra.mxu0 %v1181_v35  ;;  %v1050_v37 = vpop.f32.mrf.mxu1  ;;  %1368 = vperm.xlu1 %1901, %v1350_v36  }
 0x1a5   :  { %v1146_v4 = vpop.f32.mrf.mxu3  ;;  %v1051_v40 = vadd.f32 %v1050_v37, %v1002_v39 }
 0x1a6   :  { %v1147_v43 = vadd.f32 %v1146_v4, %v1098_v26 }
 0x1a8   :  { %v1171_v53 = vmax.f32 %v1147_v43, 0.0 }
 0x1aa   :  { %v1099_v42 = vpop.f32.mrf.mxu2 }
 0x1ab   :  { %v1100_v44 = vadd.f32 %v1099_v42, %v1051_v40  ;;  %v1354_v42 = vld [vmem:[%s2249_s5 + $0x20] sm:$0xff] }
 0x1ac   :  { %v1053_v47 = vpop.f32.mrf.mxu1  ;;  %1373 = vperm.xlu1 %1901, %v1351_v51  }
 0x1ad   :  { %v1148_v45 = vpop.f32.mrf.mxu3  ;;  %v1054_v61 = vadd.f32 %v1053_v47, %v1005_v60  ;;  %v1356_v47 = vld [vmem:[%s2249_s5 + $0x30] sm:$0xff] }
 0x1ae   :  { %v1149_v49 = vadd.f32 %v1148_v45, %v1100_v44 }
 0x1b0   :  { %v1172_v55 = vmax.f32 %v1149_v49, 0.0 }
 0x1b2   :  { %v1182_v58 = vpack.c.bf16 %v1172_v55, %v1171_v53  ;;  %v1102_v52 = vpop.f32.mrf.mxu2 }
 0x1b3   :  { %v1103_v62 = vadd.f32 %v1102_v52, %v1054_v61  ;;  %v1353_v61 = vld [vmem:[%s2249_s5 + $0x18] sm:$0xff] }
 0x1b4   :  { %1286 = vmatmul.bf16.gmra.mxu0 %v1182_v58  ;;  %v1055_v41 = vpop.f32.mrf.mxu1  ;;  %1388 = vperm.xlu1 %1901, %v1354_v42   ;;  %v1352_v58 = vld [vmem:[%s2249_s5 + $0x10] sm:$0xff] }
 0x1b5   :  { %v1151_v6 = vpop.f32.mrf.mxu3  ;;  %v1056_v1 = vadd.f32 %v1055_v41, %v1007_v12  ;;  %1378 = vperm.xlu2 %1902, %v1352_v58   ;;  %v1360_v41 = vld [vmem:[%s2249_s5 + $0x50] sm:$0xff] }
 0x1b6   :  { %v1152_v3 = vadd.f32 %v1151_v6, %v1103_v62 }
 0x1b8   :  { %v1173_v11 = vmax.f32 %v1152_v3, 0.0 }
 0x1ba   :  { %v1104_v54 = vpop.f32.mrf.mxu2 }
 0x1bb   :  { %v1105_v5 = vadd.f32 %v1104_v54, %v1056_v1  ;;  %v1355_v54 = vld [vmem:[%s2249_s5 + $0x28] sm:$0xff] }
 0x1bc   :  { %v1058_v7 = vpop.f32.mrf.mxu1  ;;  %1398 = vperm.xlu1 %1901, %v1356_v47  }
 0x1bd   :  { %v1153_v24 = vpop.f32.mrf.mxu3  ;;  %v1059_v17 = vadd.f32 %v1058_v7, %v1010_v16  ;;  %1383 = vperm.xlu2 %1902, %v1353_v61   ;;  %v1364_v7 = vld [vmem:[%s2249_s5 + $0x70] sm:$0xff]  ;;  %v1359_v16 = vld [vmem:[%s2249_s5 + $0x48] sm:$0xff] }
 0x1be   :  { %v1154_v10 = vadd.f32 %v1153_v24, %v1105_v5 }
 0x1c0   :  { %v1174_v20 = vmax.f32 %v1154_v10, 0.0  ;;  %v1357_v10 = vld [vmem:[%s2249_s5 + $0x38] sm:$0xff] }
 0x1c2   :  { %v1183_v14 = vpack.c.bf16 %v1174_v20, %v1173_v11  ;;  %v1107_v46 = vpop.f32.mrf.mxu2 }
 0x1c3   :  { %v1108_v0 = vadd.f32 %v1107_v46, %v1059_v17  ;;  %v1483_v46 = vld [vmem:[#allocation2] sm:$0x1] }
 0x1c4   :  { %1291 = vmatmul.bf16.gmra.mxu0 %v1183_v14  ;;  %v1060_v63 = vpop.f32.mrf.mxu1  ;;  %1408 = vperm.xlu1 %1901, %v1358_v8  }
 0x1c5   :  { %v1156_v9 = vpop.f32.mrf.mxu3  ;;  %v1061_v13 = vadd.f32 %v1060_v63, %v1012_v34  ;;  %1393 = vperm.xlu2 %1902, %v1355_v54   ;;  %v1361_v63 = vld [vmem:[%s2249_s5 + $0x58] sm:$0xff] }
 0x1c6   :  { %v1157_v21 = vadd.f32 %v1156_v9, %v1108_v0 }
 0x1c8   :  { %v1175_v23 = vmax.f32 %v1157_v21, 0.0 }
 0x1ca   :  { %v1109_v19 = vpop.f32.mrf.mxu2 }
 0x1cb   :  { %v1110_v18 = vadd.f32 %v1109_v19, %v1061_v13  ;;  %v1363_v19 = vld [vmem:[%s2249_s5 + $0x68] sm:$0xff] }
 0x1cc   :  { %1418 = vperm.xlu1 %1901, %v1360_v41  }
 0x1cd   :  { %v1158_v57 = vpop.f32.mrf.mxu3  ;;  %1403 = vperm.xlu2 %1902, %v1357_v10  }
 0x1ce   :  { %v1159_v22 = vadd.f32 %v1158_v57, %v1110_v18 }
 0x1d0   :  { %v1176_v50 = vmax.f32 %v1159_v22, 0.0  ;;  %v1365_v22 = vld [vmem:[%s2249_s5 + $0x78] sm:$0xff]  ;;  %s1990_s5 = smov [#allocation8]  }
 0x1d1   :  { %s1497_s10 = sshll.u32 %s1990_s5, 4  ;;  %s1498_s10 = int_to_ptr.vmem [resolvable:$true] %s1497_s10 }
 0x1d2   :  { %v1184_v25 = vpack.c.bf16 %v1176_v50, %v1175_v23 }
 0x1d4   :  { %1296 = vmatmul.bf16.gmra.mxu0 %v1184_v25  ;;  %1428 = vperm.xlu1 %1901, %v1362_v2  }
 0x1d5   :  { %1413 = vperm.xlu2 %1902, %v1359_v16  }
 0x1dc   :  { %1438 = vperm.xlu1 %1901, %v1364_v7  }
 0x1dd   :  { %1423 = vperm.xlu2 %1902, %v1361_v63  }
 0x1e1   :  { %v1262_v28 = vpop.f32.mrf.mxu0 }
 0x1e2   :  { %v1263_v29 = vadd.f32 %v2172_v59, %v1262_v28 }
 0x1e4   :  { %v1302_v56 = vmax.f32 %v1263_v29, 0.0  ;;  %1486 = vperm.xlu1 %1901, %v1483_v46  }
 0x1e5   :  { %1433 = vperm.xlu2 %1902, %v1363_v19  }
 0x1e6   :  { %1318 = vxpose.xlu0.b32.start [1/16] %v1302_v56, 128 }
 0x1e9   :  { %v1264_v30 = vpop.f32.mrf.mxu0 }
 0x1ea   :  { %v1265_v31 = vadd.f32 %v2172_v59, %v1264_v30 }
 0x1ec   :  { %v1303_v32 = vmax.f32 %v1265_v31, 0.0 }
 0x1ed   :  { %1443 = vperm.xlu2 %1902, %v1365_v22  }
 0x1ee   :  { %1319 = vxpose.xlu0.b32.cont [2/16] %v1303_v32, 128 }
 0x1f1   :  { %v1267_v48 = vpop.f32.mrf.mxu0 }
 0x1f2   :  { %v1268_v33 = vadd.f32 %v2172_v59, %v1267_v48 }
 0x1f4   :  { %v1304_v35 = vmax.f32 %v1268_v33, 0.0 }
 0x1f6   :  { %1320 = vxpose.xlu0.b32.cont [3/16] %v1304_v35, 128 }
 0x1f9   :  { %v1269_v4 = vpop.f32.mrf.mxu0 }
 0x1fa   :  { %v1270_v37 = vadd.f32 %v2172_v59, %v1269_v4 }
 0x1fc   :  { %v1305_v38 = vmax.f32 %v1270_v37, 0.0 }
 0x1fe   :  { %1321 = vxpose.xlu0.b32.cont [4/16] %v1305_v38, 128 }
 0x201   :  { %v1272_v39 = vpop.f32.mrf.mxu0 }
 0x202   :  { %v1273_v26 = vadd.f32 %v2172_v59, %v1272_v39 }
 0x204   :  { %v1306_v40 = vmax.f32 %v1273_v26, 0.0 }
 0x206   :  { %1322 = vxpose.xlu0.b32.cont [5/16] %v1306_v40, 128 }
 0x209   :  { %v1274_v43 = vpop.f32.mrf.mxu0 }
 0x20a   :  { %v1275_v44 = vadd.f32 %v2172_v59, %v1274_v43 }
 0x20c   :  { %v1307_v45 = vmax.f32 %v1275_v44, 0.0 }
 0x20e   :  { %1323 = vxpose.xlu0.b32.cont [6/16] %v1307_v45, 128 }
 0x20f   :  { %v1379_v4 = vpop.permute.xlu2 %1378 }
 0x211   :  { %v1277_v49 = vpop.f32.mrf.mxu0 }
 0x212   :  { %v1278_v53 = vadd.f32 %v2172_v59, %v1277_v49 }
 0x214   :  { %v1308_v55 = vmax.f32 %v1278_v53, 0.0 }
 0x216   :  { %1324 = vxpose.xlu0.b32.cont [7/16] %v1308_v55, 128  ;;  %v1369_v30 = vpop.permute.xlu1 %1368 }
 0x217   :  { %v1384_v39 = vpop.permute.xlu2 %1383 }
 0x219   :  { %v1279_v52 = vpop.f32.mrf.mxu0 }
 0x21a   :  { %v1280_v60 = vadd.f32 %v2172_v59, %v1279_v52 }
 0x21c   :  { %v1309_v6 = vmax.f32 %v1280_v60, 0.0 }
 0x21e   :  { %1325 = vxpose.xlu0.b32.cont [8/16] %v1309_v6, 128  ;;  %v1374_v32 = vpop.permute.xlu1 %1373 }
 0x21f   :  { %v1394_v8 = vpop.permute.xlu2 %1393 }
 0x221   :  { %v1282_v12 = vpop.f32.mrf.mxu0 }
 0x222   :  { %v1283_v62 = vadd.f32 %v2172_v59, %v1282_v12 }
 0x224   :  { %v1310_v1 = vmax.f32 %v1283_v62, 0.0 }
 0x226   :  { %1326 = vxpose.xlu0.b32.cont [9/16] %v1310_v1, 128  ;;  %v1389_v43 = vpop.permute.xlu1 %1388 }
 0x227   :  { %v1404_v60 = vpop.permute.xlu2 %1403 }
 0x229   :  { %v1284_v3 = vpop.f32.mrf.mxu0 }
 0x22a   :  { %v1285_v5 = vadd.f32 %v2172_v59, %v1284_v3 }
 0x22c   :  { %v1311_v24 = vmax.f32 %v1285_v5, 0.0 }
 0x22e   :  { %1327 = vxpose.xlu0.b32.cont [10/16] %v1311_v24, 128  ;;  %v1399_v52 = vpop.permute.xlu1 %1398 }
 0x22f   :  { %v1414_v12 = vpop.permute.xlu2 %1413 }
 0x231   :  { %v1287_v11 = vpop.f32.mrf.mxu0 }
 0x232   :  { %v1288_v20 = vadd.f32 %v2172_v59, %v1287_v11 }
 0x234   :  { %v1312_v14 = vmax.f32 %v1288_v20, 0.0 }
 0x236   :  { %1328 = vxpose.xlu0.b32.cont [11/16] %v1312_v14, 128  ;;  %v1409_v41 = vpop.permute.xlu1 %1408 }
 0x237   :  { %v1424_v54 = vpop.permute.xlu2 %1423 }
 0x239   :  { %v1289_v9 = vpop.f32.mrf.mxu0 }
 0x23a   :  { %v1290_v15 = vadd.f32 %v2172_v59, %v1289_v9 }
 0x23c   :  { %v1313_v17 = vmax.f32 %v1290_v15, 0.0 }
 0x23e   :  { %1329 = vxpose.xlu0.b32.cont [12/16] %v1313_v17, 128  ;;  %v1419_v62 = vpop.permute.xlu1 %1418 }
 0x23f   :  { %v1434_v9 = vpop.permute.xlu2 %1433 }
 0x241   :  { %v1292_v34 = vpop.f32.mrf.mxu0 }
 0x242   :  { %v1293_v0 = vadd.f32 %v2172_v59, %v1292_v34 }
 0x244   :  { %v1314_v13 = vmax.f32 %v1293_v0, 0.0 }
 0x246   :  { %1330 = vxpose.xlu0.b32.cont [13/16] %v1314_v13, 128 }
 0x249   :  { %v1294_v21 = vpop.f32.mrf.mxu0 }
 0x24a   :  { %v1295_v18 = vadd.f32 %v2172_v59, %v1294_v21 }
 0x24c   :  { %v1315_v57 = vmax.f32 %v1295_v18, 0.0 }
 0x24e   :  { %1331 = vxpose.xlu0.b32.cont [14/16] %v1315_v57, 128 }
 0x251   :  { %v1297_v23 = vpop.f32.mrf.mxu0 }
 0x252   :  { %v1298_v50 = vadd.f32 %v2172_v59, %v1297_v23  ;;  %v1444_v23 = vpop.permute.xlu2 %1443 }
 0x254   :  { %v1316_v25 = vmax.f32 %v1298_v50, 0.0 }
 0x256   :  { %1332 = vxpose.xlu0.b32.cont [15/16] %v1316_v25, 128 }
 0x259   :  { %v1299_v28 = vpop.f32.mrf.mxu0 }
 0x25a   :  { %v1300_v29 = vadd.f32 %v2172_v59, %v1299_v28 }
 0x25c   :  { %v1317_v56 = vmax.f32 %v1300_v29, 0.0 }
 0x25e   :  { %1333 = vxpose.xlu0.b32.end [16/16] %v1317_v56, 128 }
 0x28a   :  { %v1334_v31 = vpop.trf.xlu0 }
 0x28b   :  { %v1446_v33 = vmul.f32 %v1369_v30, %v1334_v31 }
 0x292   :  { %v1335_v48 = vpop.trf.xlu0 }
 0x293   :  { %v1447_v35 = vmul.f32 %v1374_v32, %v1335_v48 }
 0x295   :  { %v1462_v36 = vadd.f32 %v1447_v35, %v1446_v33 }
 0x29a   :  { %v1336_v37 = vpop.trf.xlu0 }
 0x29b   :  { %v1448_v38 = vmul.f32 %v1379_v4, %v1336_v37 }
 0x29d   :  { %v1463_v51 = vadd.f32 %v1462_v36, %v1448_v38 }
 0x2a2   :  { %v1337_v26 = vpop.trf.xlu0 }
 0x2a3   :  { %v1449_v40 = vmul.f32 %v1384_v39, %v1337_v26 }
 0x2a5   :  { %v1464_v42 = vadd.f32 %v1463_v51, %v1449_v40 }
 0x2aa   :  { %v1338_v44 = vpop.trf.xlu0 }
 0x2ab   :  { %v1450_v59 = vmul.f32 %v1389_v43, %v1338_v44 }
 0x2ad   :  { %v1465_v45 = vadd.f32 %v1464_v42, %v1450_v59 }
 0x2b2   :  { %v1339_v47 = vpop.trf.xlu0 }
 0x2b3   :  { %v1451_v2 = vmul.f32 %v1394_v8, %v1339_v47 }
 0x2b5   :  { %v1466_v5 = vadd.f32 %v1465_v45, %v1451_v2 }
 0x2ba   :  { %v1340_v49 = vpop.trf.xlu0 }
 0x2bb   :  { %v1452_v3 = vmul.f32 %v1399_v52, %v1340_v49 }
 0x2bd   :  { %v1467_v10 = vadd.f32 %v1466_v5, %v1452_v3 }
 0x2c2   :  { %v1341_v53 = vpop.trf.xlu0 }
 0x2c3   :  { %v1453_v24 = vmul.f32 %v1404_v60, %v1341_v53 }
 0x2c5   :  { %1903 = vset.pattern.permute.xlu0 %v1989_v27  ;;  %v1429_v27 = vpop.permute.xlu1 %1428  ;;  %v1468_v20 = vadd.f32 %v1467_v10, %v1453_v24 }
 0x2ca   :  { %v1342_v55 = vpop.trf.xlu0 }
 0x2cb   :  { %v1454_v11 = vmul.f32 %v1409_v41, %v1342_v55 }
 0x2cd   :  { %v1469_v46 = vadd.f32 %v1468_v20, %v1454_v11  ;;  %v1439_v21 = vpop.permute.xlu1 %1438 }
 0x2d2   :  { %v1343_v58 = vpop.trf.xlu0 }
 0x2d3   :  { %v1455_v14 = vmul.f32 %v1414_v12, %v1343_v58 }
 0x2d5   :  { %v1470_v15 = vadd.f32 %v1469_v46, %v1455_v14  ;;  %v1487_v48 = vpop.permute.xlu1 %1486 }
 0x2d6   :  { %v1489_v35 = vperm.slane %v1487_v48, 0 }
 0x2da   :  { %v1344_v6 = vpop.trf.xlu0 }
 0x2db   :  { %v1456_v16 = vmul.f32 %v1419_v62, %v1344_v6 }
 0x2dd   :  { %v1471_v34 = vadd.f32 %v1470_v15, %v1456_v16 }
 0x2e2   :  { %v1345_v61 = vpop.trf.xlu0 }
 0x2e3   :  { %v1457_v17 = vmul.f32 %v1424_v54, %v1345_v61 }
 0x2e5   :  { %v1472_v13 = vadd.f32 %v1471_v34, %v1457_v17 }
 0x2ea   :  { %v1346_v1 = vpop.trf.xlu0 }
 0x2eb   :  { %v1458_v0 = vmul.f32 %v1429_v27, %v1346_v1 }
 0x2ed   :  { %v1473_v18 = vadd.f32 %v1472_v13, %v1458_v0 }
 0x2f2   :  { %v1347_v7 = vpop.trf.xlu0 }
 0x2f3   :  { %v1459_v19 = vmul.f32 %v1434_v9, %v1347_v7 }
 0x2f5   :  { %v1474_v22 = vadd.f32 %v1473_v18, %v1459_v19 }
 0x2fa   :  { %v1348_v63 = vpop.trf.xlu0 }
 0x2fb   :  { %v1460_v57 = vmul.f32 %v1439_v21, %v1348_v63 }
 0x2fd   :  { %v1475_v25 = vadd.f32 %v1474_v22, %v1460_v57 }
 0x302   :  { %v1349_v50 = vpop.trf.xlu0 }
 0x303   :  { %v1461_v28 = vmul.f32 %v1444_v23, %v1349_v50 }
 0x305   :  { %v1476_v29 = vadd.f32 %v1475_v25, %v1461_v28 }
 0x307   :  { %v1477_v56 = vrot.slane %v1476_v29, 4 }
 0x309   :  { %v1478_v30 = vadd.f32 %v1477_v56, %v1476_v29 }
 0x30b   :  { %v1479_v31 = vrot.slane %v1478_v30, 2 }
 0x30d   :  { %v1480_v32 = vadd.f32 %v1479_v31, %v1478_v30 }
 0x30f   :  { %v1481_v33 = vrot.slane %v1480_v32, 1 }
 0x311   :  { %v1482_v36 = vadd.f32 %v1481_v33, %v1480_v32 }
 0x313   :  { %v1490_v4 = vadd.f32 %v1489_v35, %v1482_v36 }
 0x315   :  { %1491 = vst [vmem:[#allocation8] sm:$0x1] %v1490_v4 }
 0x316   :  { %1502 = dma.vmem_to_hbm [thread:$0]  %s1498_s10, 16, %s1500_s6, [#allocation5]  }
 0x317   :  { %1982 = dma.done.wait [#allocation5], 16  }
 0x318   :  { %1983 = vsyncadd [#allocation5], 4294967280 }
 0x319   :  { %1507 = vsyncpa [#allocation4], 1 }
 0x31a   :  { %1508 = vsyncpa [#allocation7], 1 }
 0x31b   :  { %1509 = vsyncpa [#allocation5], 1 }

</bundles_post_ra>
